<compile_context>
chip_gen: v5e
topology: v5e:2x2
jax: 0.10.0
libtpu: 0.0.40
codegen_flags: <defaults>
</compile_context>

<pallas_src>
import functools

import jax
import jax.numpy as jnp
from jax.experimental import pallas as pl
from jax.experimental.pallas import tpu as pltpu


# -----------------------------------------------------------------------------
# Kernel
# -----------------------------------------------------------------------------
def aft_simple_kernel(x_ref, wkvq_ref, bkvq_ref, wo_ref, bo_ref, o_ref, *,
                      block_b, approx_recip):
    # x_ref / o_ref: (block_b*T, D) slabs.  wkvq: (D, 3D); bkvq: (1, 3D);
    # wo: (D, D); bo: (1, D).
    rows, d = x_ref.shape
    t = rows // block_b

    # ---- Fused K/V/Q projection: one (rows, D) @ (D, 3D) MXU matmul --------
    x2d = x_ref[...]
    if x2d.dtype != wkvq_ref.dtype:
        x2d = x2d.astype(wkvq_ref.dtype)            # bf16 operands, f32 accum
    kvq = jnp.dot(x2d, wkvq_ref[...], preferred_element_type=jnp.float32)
    kvq = kvq + bkvq_ref[...]                       # (rows, 3D), f32

    # ---- Softmax over the sequence axis + query gating, batched over Bt ----
    # Layout-preserving reshape: the sublane axis (rows) splits into (Bt, T)
    # with T % 8 == 0; the lane axis (3D) is untouched.
    kvq3 = kvq.reshape(block_b, t, 3 * d)
    k = kvq3[:, :, 0 * d:1 * d]                     # (Bt, T, D)
    v = kvq3[:, :, 1 * d:2 * d]                     # (Bt, T, D)
    q = kvq3[:, :, 2 * d:3 * d]                     # (Bt, T, D)

    k_max = jnp.max(k, axis=1, keepdims=True)       # (Bt, 1, D)
    e = jnp.exp(k - k_max)                          # (Bt, T, D)
    denom = jnp.sum(e, axis=1, keepdims=True)       # (Bt, 1, D)
    num = jnp.sum(e * v, axis=1, keepdims=True)     # (Bt, 1, D)
    # sum(softmax(K,dim=1)*V) == sum(e*v) / sum(e); the reciprocal acts only
    # on the reduced (Bt, 1, D) tensor (no materialized attention array) and
    # goes to the EUP slot when approx_recip=True.
    yt = num * pl.reciprocal(denom, approx=approx_recip)
    y = jax.nn.sigmoid(q) * yt                      # (Bt, T, D), broadcast T

    # ---- Output projection: one (rows, D) @ (D, D) MXU matmul --------------
    y2d = y.reshape(rows, d)
    if y2d.dtype != wo_ref.dtype:
        y2d = y2d.astype(wo_ref.dtype)
    out = jnp.dot(y2d, wo_ref[...], preferred_element_type=jnp.float32)
    out = out + bo_ref[...]                         # (rows, D), f32

    # dropout(p=0.0) is the identity.  Single dense, lane-aligned store.
    o_ref[...] = out.astype(o_ref.dtype)


# -----------------------------------------------------------------------------
# Tiling / VMEM policy
# -----------------------------------------------------------------------------
def _vmem_capacity_bytes():
    """Physical per-core VMEM (128 MiB v5e/v6e, 64 MiB v7x); conservative
    fallback if the trace-time query is unavailable."""
    try:
        cap = getattr(pltpu.get_tpu_info(), "vmem_capacity_bytes", None)
        if cap:
            return int(cap)
    except Exception:
        pass
    return 64 * 1024 * 1024


def _vmem_footprint_bytes(block_b, t, d, x_bytes, w_bytes, weight_buffers):
    """Rough per-step VMEM footprint: double-buffered x/out blocks, the
    (optionally single-buffered) weight/bias blocks, and ~10 live f32
    row-slab intermediates (kvq x3, e, e*v, y, out, temporaries)."""
    rows = block_b * t
    io = 2 * 2 * rows * d * x_bytes                 # x + out, double-buffered
    weights = weight_buffers * (3 * d * d + d * d + 4 * d) * w_bytes
    live = 10 * rows * d * 4
    return io + weights + live


def _pick_block_b(batch, t, d, *, x_bytes, w_bytes, weight_buffers,
                  vmem_budget, target_rows=256):
    """Smallest divisor of `batch` whose fused matmuls have >= target_rows
    LHS rows (fills the 256-row MXU on v6e/v7x) subject to the VMEM budget,
    capped at batch//2 so the 'parallel' grid axis has >= 2 steps for v7x's
    two TensorCores."""
    cap = batch if batch < 2 else max(1, batch // 2)
    divisors = [b for b in range(1, cap + 1) if batch % b == 0]
    feasible = [b for b in divisors
                if _vmem_footprint_bytes(b, t, d, x_bytes, w_bytes,
                                         weight_buffers) <= vmem_budget]
    if not feasible:
        return 1
    for b in feasible:
        if b * t >= target_rows:
            return b
    return feasible[-1]


# -----------------------------------------------------------------------------
# pallas_call builder + wrapper
# -----------------------------------------------------------------------------
def _build_call(batch, t, d, block_b, out_dtype, vmem_limit, *,
                single_buffer_weights, approx_recip):
    rows = block_b * t

    def const_spec(shape):
        # Constant index_map -> the block is fetched once; single-buffer it
        # (halves weight VMEM, matters most for large D on v7x's 64 MiB).
        if single_buffer_weights:
            return pl.BlockSpec(shape, lambda b: (0, 0),
                                pipeline_mode=pl.Buffered(1))
        return pl.BlockSpec(shape, lambda b: (0, 0))

    kernel = functools.partial(aft_simple_kernel, block_b=block_b,
                               approx_recip=approx_recip)
    return pl.pallas_call(
        kernel,
        out_shape=jax.ShapeDtypeStruct((batch * t, d), out_dtype),
        grid_spec=pltpu.PrefetchScalarGridSpec(
            num_scalar_prefetch=0,
            grid=(batch // block_b,),
            in_specs=[
                pl.BlockSpec((rows, d), lambda b: (b, 0)),       # x slab
                const_spec((d, 3 * d)),                          # W_kvq
                const_spec((1, 3 * d)),                          # b_kvq
                const_spec((d, d)),                              # W_o
                const_spec((1, d)),                              # b_o
            ],
            out_specs=pl.BlockSpec((rows, d), lambda b: (b, 0)),
        ),
        compiler_params=pltpu.CompilerParams(
            dimension_semantics=("parallel",),
            vmem_limit_bytes=vmem_limit),
    )


def aft_simple(x, wk, bk, wv, bv, wq, bq, wo, bo, *, block_b=None,
               matmul_dtype=jnp.bfloat16, approx_reciprocal=True,
               single_buffer_weights=True):
    """AFTSimple forward (query=True, dropout p=0.0).  Weights are
    pre-transposed (kernel computes x @ W + b); biases are shaped (1, D).
    `matmul_dtype` casts the matmul *operands* only (f32 accumulation and f32
    softmax / sigmoid / bias math); pass None for full-f32 matmuls.  bf16
    activations are accepted as-is and the output dtype equals x.dtype."""
    batch, t, d = x.shape
    # The fused-KVQ lane slices and the (8, 128)-tiled weight / x blocks
    # require lane-/sublane-aligned shapes.
    assert d % 128 == 0, "features must be a multiple of 128 (lane width)"
    assert t % 8 == 0, "sequence length must be a multiple of 8 (sublanes)"

    # Fuse the three projections into one wide weight / bias (once, in HBM).
    w_kvq = jnp.concatenate([wk, wv, wq], axis=1)    # (D, 3D)
    b_kvq = jnp.concatenate([bk, bv, bq], axis=1)    # (1, 3D)
    wo_mm = wo
    if matmul_dtype is not None:
        w_kvq = w_kvq.astype(matmul_dtype)
        wo_mm = wo.astype(matmul_dtype)

    x_bytes = jnp.dtype(x.dtype).itemsize
    w_bytes = jnp.dtype(w_kvq.dtype).itemsize
    weight_buffers = 1 if single_buffer_weights else 2
    vmem_cap = _vmem_capacity_bytes()

    if block_b is None:
        block_b = _pick_block_b(batch, t, d, x_bytes=x_bytes, w_bytes=w_bytes,
                                weight_buffers=weight_buffers,
                                vmem_budget=int(0.45 * vmem_cap))
    assert batch % block_b == 0, "block_b must divide the batch size"

    footprint = _vmem_footprint_bytes(block_b, t, d, x_bytes, w_bytes,
                                      weight_buffers)
    vmem_limit = int(min(0.9 * vmem_cap,
                         max(32 * 1024 * 1024, 2 * footprint)))

    x2d = x.reshape(batch * t, d)                    # free, row-major view
    args = (x2d, w_kvq, b_kvq, wo_mm, bo)
    build = functools.partial(_build_call, batch, t, d, block_b, x.dtype,
                              vmem_limit, approx_recip=approx_reciprocal)
    if single_buffer_weights:
        try:
            out2d = build(single_buffer_weights=True)(*args)
        except Exception:
            # Runtimes without pipeline_mode / Buffered(1) support: fall back
            # to default double-buffered weight blocks (correctness unchanged).
            out2d = build(single_buffer_weights=False)(*args)
    else:
        out2d = build(single_buffer_weights=False)(*args)
    return out2d.reshape(batch, t, d)


# -----------------------------------------------------------------------------
# Pure-JAX reference (mirrors the PyTorch forward)
# -----------------------------------------------------------------------------
def aft_simple_ref(x, wk, bk, wv, bv, wq, bq, wo, bo, matmul_dtype=None):
    """Reference.  For the f32 path the dots use HIGHEST precision (the
    kernel's f32 MXU matmul is the accurate multi-pass mode, not XLA's
    single-pass bf16 default); the bf16 path mirrors the kernel's cast."""
    if matmul_dtype is None:
        md, prec = x.dtype, jax.lax.Precision.HIGHEST
    else:
        md, prec = matmul_dtype, None

    def mm(a, w):
        return jnp.dot(a.astype(md), w.astype(md),
                       preferred_element_type=jnp.float32, precision=prec)

    k = mm(x, wk) + bk
    v = mm(x, wv) + bv
    attn = jax.nn.softmax(k, axis=1)
    yt = jnp.sum(attn * v, axis=1, keepdims=True)
    q = mm(x, wq) + bq
    y = jax.nn.sigmoid(q) * yt
    return (mm(y, wo) + bo).astype(x.dtype)


if __name__ == "__main__":
    # Lane-/sublane-friendly small shapes: D = 128 (one lane tile), T = 16
    # (two sublane tiles), B = 8 so the auto-picked block_b = 4 gives a
    # 2-step "parallel" grid (both v7x TensorCores busy) and 64-row fused
    # matmuls per step.
    B, T, D = 8, 16, 128
    key = jax.random.PRNGKey(0)
    keys = jax.random.split(key, 9)

    x = jax.random.normal(keys[0], (B, T, D), dtype=jnp.float32)

    # nn.Linear-style params, stored pre-transposed (kernel computes x@W + b).
    def init_linear(kw, kb):
        w = jax.random.normal(kw, (D, D), dtype=jnp.float32) / jnp.sqrt(D)
        b = jax.random.normal(kb, (1, D), dtype=jnp.float32) * 0.01
        return w, b

    wk, bk = init_linear(keys[1], keys[2])
    wv, bv = init_linear(keys[3], keys[4])
    wq, bq = init_linear(keys[5], keys[6])
    wo, bo = init_linear(keys[7], keys[8])
    params = (wk, bk, wv, bv, wq, bq, wo, bo)

    # Default / production path: bf16 matmul operands (MXU-native), f32
    # accumulation + f32 softmax/sigmoid, approximate (EUP) reciprocal,
    # auto-picked block_b.  Reference mirrors the same operand cast.
    out = jax.block_until_ready(aft_simple(x, *params))
    ref = aft_simple_ref(x, *params, matmul_dtype=jnp.bfloat16)
    assert out.shape == (B, T, D)
    assert jnp.allclose(out, ref, atol=1e-2, rtol=1e-2), \
        "bf16-operand path mismatch vs reference"

    # Full-f32 matmul path with exact reciprocal.  Tolerance covers MXU
    # pass-count policy differences between Mosaic and XLA for f32 operands.
    out_f32 = jax.block_until_ready(
        aft_simple(x, *params, matmul_dtype=None, approx_reciprocal=False))
    ref_f32 = aft_simple_ref(x, *params)
    assert out_f32.shape == (B, T, D)
    assert jnp.allclose(out_f32, ref_f32, atol=5e-2, rtol=5e-2), \
        "f32 path mismatch vs reference"

    print("KERNEL_OK")
</pallas_src>

<mosaic_0001>
module attributes {stable_mosaic.version = 11 : i64} {
  func.func @aft_simple_kernel(%arg0: i32, %arg1: memref<64x128xf32, #tpu.memory_space<vmem>>, %arg2: memref<128x384xbf16, #tpu.memory_space<vmem>>, %arg3: memref<1x384xf32, #tpu.memory_space<vmem>>, %arg4: memref<128x128xbf16, #tpu.memory_space<vmem>>, %arg5: memref<1x128xf32, #tpu.memory_space<vmem>>, %arg6: memref<64x128xf32, #tpu.memory_space<vmem>>) attributes {dimension_semantics = [#tpu.dimension_semantics<parallel>], iteration_bounds = array<i64: 2>, scalar_prefetch = 0 : i64, scratch_operands = 0 : i64, tpu.core_type = #tpu.core_type<tc>, window_params = [{transform_indices = @transform_0, window_bounds = array<i64: 64, 128>}, {pipeline_mode = #tpu.pipeline_mode<synchronous>, transform_indices = @transform_1, window_bounds = array<i64: 128, 384>}, {pipeline_mode = #tpu.pipeline_mode<synchronous>, transform_indices = @transform_2, window_bounds = array<i64: 1, 384>}, {pipeline_mode = #tpu.pipeline_mode<synchronous>, transform_indices = @transform_3, window_bounds = array<i64: 128, 128>}, {pipeline_mode = #tpu.pipeline_mode<synchronous>, transform_indices = @transform_4, window_bounds = array<i64: 1, 128>}, {transform_indices = @transform_5, window_bounds = array<i64: 64, 128>}]} {
    %c0 = arith.constant 0 : index
    %c0_0 = arith.constant 0 : index
    %0 = vector.load %arg1[%c0, %c0_0] : memref<64x128xf32, #tpu.memory_space<vmem>>, vector<64x128xf32>
    %1 = arith.truncf %0 : vector<64x128xf32> to vector<64x128xbf16>
    %c0_1 = arith.constant 0 : index
    %c0_2 = arith.constant 0 : index
    %2 = vector.load %arg2[%c0_1, %c0_2] : memref<128x384xbf16, #tpu.memory_space<vmem>>, vector<128x384xbf16>
    %cst = arith.constant dense<0.000000e+00> : vector<64x384xf32>
    %3 = tpu.matmul %1, %2, %cst {dimension_numbers = #tpu.dot_dimension_numbers<[1], [0], [0], [1], [0, 0, 1, 1], [], []>} : vector<64x128xbf16>, vector<128x384xbf16>, vector<64x384xf32> -> vector<64x384xf32>
    %c0_3 = arith.constant 0 : index
    %c0_4 = arith.constant 0 : index
    %4 = vector.load %arg3[%c0_3, %c0_4] : memref<1x384xf32, #tpu.memory_space<vmem>>, vector<1x384xf32>
    %5 = vector.broadcast %4 : vector<1x384xf32> to vector<64x384xf32>
    %6 = arith.addf %3, %5 : vector<64x384xf32>
    %7 = vector.shape_cast %6 : vector<64x384xf32> to vector<4x16x384xf32>
    %8 = vector.extract_strided_slice %7 {offsets = [0, 0, 0], sizes = [4, 16, 128], strides = [1, 1, 1]} : vector<4x16x384xf32> to vector<4x16x128xf32>
    %9 = vector.extract_strided_slice %7 {offsets = [0, 0, 128], sizes = [4, 16, 128], strides = [1, 1, 1]} : vector<4x16x384xf32> to vector<4x16x128xf32>
    %10 = vector.extract_strided_slice %7 {offsets = [0, 0, 256], sizes = [4, 16, 128], strides = [1, 1, 1]} : vector<4x16x384xf32> to vector<4x16x128xf32>
    %cst_5 = arith.constant dense<0xFF800000> : vector<4x128xf32>
    %11 = vector.multi_reduction <maximumf>, %8, %cst_5 [1] : vector<4x16x128xf32> to vector<4x128xf32>
    %12 = vector.shape_cast %11 : vector<4x128xf32> to vector<4x1x128xf32>
    %13 = vector.broadcast %12 : vector<4x1x128xf32> to vector<4x16x128xf32>
    %14 = arith.subf %8, %13 : vector<4x16x128xf32>
    %15 = math.exp %14 : vector<4x16x128xf32>
    %cst_6 = arith.constant dense<0.000000e+00> : vector<4x128xf32>
    %16 = vector.multi_reduction <add>, %15, %cst_6 [1] : vector<4x16x128xf32> to vector<4x128xf32>
    %17 = vector.shape_cast %16 : vector<4x128xf32> to vector<4x1x128xf32>
    %18 = arith.mulf %15, %9 : vector<4x16x128xf32>
    %cst_7 = arith.constant dense<0.000000e+00> : vector<4x128xf32>
    %19 = vector.multi_reduction <add>, %18, %cst_7 [1] : vector<4x16x128xf32> to vector<4x128xf32>
    %20 = vector.shape_cast %19 : vector<4x128xf32> to vector<4x1x128xf32>
    %21 = tpu.reciprocal %17 {approx = true} : vector<4x1x128xf32> -> vector<4x1x128xf32>
    %22 = arith.mulf %20, %21 : vector<4x1x128xf32>
    %23 = arith.negf %10 : vector<4x16x128xf32>
    %24 = math.exp %23 : vector<4x16x128xf32>
    %cst_8 = arith.constant 1.000000e+00 : f32
    %25 = vector.broadcast %cst_8 : f32 to vector<4x16x128xf32>
    %26 = arith.addf %25, %24 : vector<4x16x128xf32>
    %27 = arith.divf %25, %26 : vector<4x16x128xf32>
    %28 = vector.broadcast %22 : vector<4x1x128xf32> to vector<4x16x128xf32>
    %29 = arith.mulf %27, %28 : vector<4x16x128xf32>
    %30 = vector.shape_cast %29 : vector<4x16x128xf32> to vector<64x128xf32>
    %31 = arith.truncf %30 : vector<64x128xf32> to vector<64x128xbf16>
    %c0_9 = arith.constant 0 : index
    %c0_10 = arith.constant 0 : index
    %32 = vector.load %arg4[%c0_9, %c0_10] : memref<128x128xbf16, #tpu.memory_space<vmem>>, vector<128x128xbf16>
    %cst_11 = arith.constant dense<0.000000e+00> : vector<64x128xf32>
    %33 = tpu.matmul %31, %32, %cst_11 {dimension_numbers = #tpu.dot_dimension_numbers<[1], [0], [0], [1], [0, 0, 1, 1], [], []>} : vector<64x128xbf16>, vector<128x128xbf16>, vector<64x128xf32> -> vector<64x128xf32>
    %c0_12 = arith.constant 0 : index
    %c0_13 = arith.constant 0 : index
    %34 = vector.load %arg5[%c0_12, %c0_13] : memref<1x128xf32, #tpu.memory_space<vmem>>, vector<1x128xf32>
    %35 = vector.broadcast %34 : vector<1x128xf32> to vector<64x128xf32>
    %36 = arith.addf %33, %35 : vector<64x128xf32>
    %c0_14 = arith.constant 0 : index
    %c0_15 = arith.constant 0 : index
    %37 = vector.load %arg6[%c0_14, %c0_15] : memref<64x128xf32, #tpu.memory_space<vmem>>, vector<64x128xf32>
    tpu.vector_store %arg6[%c0_14, %c0_15], %36 {strides = array<i32>} : memref<64x128xf32, #tpu.memory_space<vmem>>, vector<64x128xf32>,
    return
  }
  func.func @transform_0(%arg0: i32) -> (i32, i32) {
    %c0_i32 = arith.constant 0 : i32
    %c0_i32_0 = arith.constant 0 : i32
    return %arg0, %c0_i32 : i32, i32
  }
  func.func @transform_1(%arg0: i32) -> (i32, i32) {
    %c0_i32 = arith.constant 0 : i32
    %c0_i32_0 = arith.constant 0 : i32
    %c0_i32_1 = arith.constant 0 : i32
    return %c0_i32, %c0_i32_0 : i32, i32
  }
  func.func @transform_2(%arg0: i32) -> (i32, i32) {
    %c0_i32 = arith.constant 0 : i32
    %c0_i32_0 = arith.constant 0 : i32
    %c0_i32_1 = arith.constant 0 : i32
    return %c0_i32, %c0_i32_0 : i32, i32
  }
  func.func @transform_3(%arg0: i32) -> (i32, i32) {
    %c0_i32 = arith.constant 0 : i32
    %c0_i32_0 = arith.constant 0 : i32
    %c0_i32_1 = arith.constant 0 : i32
    return %c0_i32, %c0_i32_0 : i32, i32
  }
  func.func @transform_4(%arg0: i32) -> (i32, i32) {
    %c0_i32 = arith.constant 0 : i32
    %c0_i32_0 = arith.constant 0 : i32
    %c0_i32_1 = arith.constant 0 : i32
    return %c0_i32, %c0_i32_0 : i32, i32
  }
  func.func @transform_5(%arg0: i32) -> (i32, i32) {
    %c0_i32 = arith.constant 0 : i32
    %c0_i32_0 = arith.constant 0 : i32
    return %arg0, %c0_i32 : i32, i32
  }
}

module attributes {stable_mosaic.version = 11 : i64} {
  func.func @aft_simple_kernel(%arg0: i32, %arg1: memref<64x128xf32, #tpu.memory_space<vmem>>, %arg2: memref<128x384xbf16, #tpu.memory_space<vmem>>, %arg3: memref<1x384xf32, #tpu.memory_space<vmem>>, %arg4: memref<128x128xbf16, #tpu.memory_space<vmem>>, %arg5: memref<1x128xf32, #tpu.memory_space<vmem>>, %arg6: memref<64x128xf32, #tpu.memory_space<vmem>>) attributes {dimension_semantics = [#tpu.dimension_semantics<parallel>], iteration_bounds = array<i64: 2>, scalar_prefetch = 0 : i64, scratch_operands = 0 : i64, tpu.core_type = #tpu.core_type<tc>, window_params = [{transform_indices = @transform_0, window_bounds = array<i64: 64, 128>}, {pipeline_mode = #tpu.pipeline_mode<synchronous>, transform_indices = @transform_1, window_bounds = array<i64: 128, 384>}, {pipeline_mode = #tpu.pipeline_mode<synchronous>, transform_indices = @transform_2, window_bounds = array<i64: 1, 384>}, {pipeline_mode = #tpu.pipeline_mode<synchronous>, transform_indices = @transform_3, window_bounds = array<i64: 128, 128>}, {pipeline_mode = #tpu.pipeline_mode<synchronous>, transform_indices = @transform_4, window_bounds = array<i64: 1, 128>}, {transform_indices = @transform_5, window_bounds = array<i64: 64, 128>}]} {
    %c0 = arith.constant 0 : index
    %c0_0 = arith.constant 0 : index
    %0 = vector.load %arg1[%c0, %c0_0] : memref<64x128xf32, #tpu.memory_space<vmem>>, vector<64x128xf32>
    %1 = arith.truncf %0 : vector<64x128xf32> to vector<64x128xbf16>
    %c0_1 = arith.constant 0 : index
    %c0_2 = arith.constant 0 : index
    %2 = vector.load %arg2[%c0_1, %c0_2] : memref<128x384xbf16, #tpu.memory_space<vmem>>, vector<128x384xbf16>
    %cst = arith.constant dense<0.000000e+00> : vector<64x384xf32>
    %3 = tpu.matmul %1, %2, %cst {dimension_numbers = #tpu.dot_dimension_numbers<[1], [0], [0], [1], [0, 0, 1, 1], [], []>} : vector<64x128xbf16>, vector<128x384xbf16>, vector<64x384xf32> -> vector<64x384xf32>
    %c0_3 = arith.constant 0 : index
    %c0_4 = arith.constant 0 : index
    %4 = vector.load %arg3[%c0_3, %c0_4] : memref<1x384xf32, #tpu.memory_space<vmem>>, vector<1x384xf32>
    %5 = vector.broadcast %4 : vector<1x384xf32> to vector<64x384xf32>
    %6 = arith.addf %3, %5 : vector<64x384xf32>
    %7 = vector.shape_cast %6 : vector<64x384xf32> to vector<4x16x384xf32>
    %8 = vector.extract_strided_slice %7 {offsets = [0, 0, 0], sizes = [4, 16, 128], strides = [1, 1, 1]} : vector<4x16x384xf32> to vector<4x16x128xf32>
    %9 = vector.extract_strided_slice %7 {offsets = [0, 0, 128], sizes = [4, 16, 128], strides = [1, 1, 1]} : vector<4x16x384xf32> to vector<4x16x128xf32>
    %10 = vector.extract_strided_slice %7 {offsets = [0, 0, 256], sizes = [4, 16, 128], strides = [1, 1, 1]} : vector<4x16x384xf32> to vector<4x16x128xf32>
    %cst_5 = arith.constant dense<0xFF800000> : vector<4x128xf32>
    %11 = vector.multi_reduction <maximumf>, %8, %cst_5 [1] : vector<4x16x128xf32> to vector<4x128xf32>
    %12 = vector.shape_cast %11 : vector<4x128xf32> to vector<4x1x128xf32>
    %13 = vector.broadcast %12 : vector<4x1x128xf32> to vector<4x16x128xf32>
    %14 = arith.subf %8, %13 : vector<4x16x128xf32>
    %15 = math.exp %14 : vector<4x16x128xf32>
    %cst_6 = arith.constant dense<0.000000e+00> : vector<4x128xf32>
    %16 = vector.multi_reduction <add>, %15, %cst_6 [1] : vector<4x16x128xf32> to vector<4x128xf32>
    %17 = vector.shape_cast %16 : vector<4x128xf32> to vector<4x1x128xf32>
    %18 = arith.mulf %15, %9 : vector<4x16x128xf32>
    %cst_7 = arith.constant dense<0.000000e+00> : vector<4x128xf32>
    %19 = vector.multi_reduction <add>, %18, %cst_7 [1] : vector<4x16x128xf32> to vector<4x128xf32>
    %20 = vector.shape_cast %19 : vector<4x128xf32> to vector<4x1x128xf32>
    %21 = tpu.reciprocal %17 {approx = true} : vector<4x1x128xf32> -> vector<4x1x128xf32>
    %22 = arith.mulf %20, %21 : vector<4x1x128xf32>
    %23 = arith.negf %10 : vector<4x16x128xf32>
    %24 = math.exp %23 : vector<4x16x128xf32>
    %cst_8 = arith.constant 1.000000e+00 : f32
    %25 = vector.broadcast %cst_8 : f32 to vector<4x16x128xf32>
    %26 = arith.addf %25, %24 : vector<4x16x128xf32>
    %27 = arith.divf %25, %26 : vector<4x16x128xf32>
    %28 = vector.broadcast %22 : vector<4x1x128xf32> to vector<4x16x128xf32>
    %29 = arith.mulf %27, %28 : vector<4x16x128xf32>
    %30 = vector.shape_cast %29 : vector<4x16x128xf32> to vector<64x128xf32>
    %31 = arith.truncf %30 : vector<64x128xf32> to vector<64x128xbf16>
    %c0_9 = arith.constant 0 : index
    %c0_10 = arith.constant 0 : index
    %32 = vector.load %arg4[%c0_9, %c0_10] : memref<128x128xbf16, #tpu.memory_space<vmem>>, vector<128x128xbf16>
    %cst_11 = arith.constant dense<0.000000e+00> : vector<64x128xf32>
    %33 = tpu.matmul %31, %32, %cst_11 {dimension_numbers = #tpu.dot_dimension_numbers<[1], [0], [0], [1], [0, 0, 1, 1], [], []>} : vector<64x128xbf16>, vector<128x128xbf16>, vector<64x128xf32> -> vector<64x128xf32>
    %c0_12 = arith.constant 0 : index
    %c0_13 = arith.constant 0 : index
    %34 = vector.load %arg5[%c0_12, %c0_13] : memref<1x128xf32, #tpu.memory_space<vmem>>, vector<1x128xf32>
    %35 = vector.broadcast %34 : vector<1x128xf32> to vector<64x128xf32>
    %36 = arith.addf %33, %35 : vector<64x128xf32>
    %c0_14 = arith.constant 0 : index
    %c0_15 = arith.constant 0 : index
    %37 = vector.load %arg6[%c0_14, %c0_15] : memref<64x128xf32, #tpu.memory_space<vmem>>, vector<64x128xf32>
    tpu.vector_store %arg6[%c0_14, %c0_15], %36 {strides = array<i32>} : memref<64x128xf32, #tpu.memory_space<vmem>>, vector<64x128xf32>,
    return
  }
  func.func @transform_0(%arg0: i32) -> (i32, i32) {
    %c0_i32 = arith.constant 0 : i32
    %c0_i32_0 = arith.constant 0 : i32
    return %arg0, %c0_i32 : i32, i32
  }
  func.func @transform_1(%arg0: i32) -> (i32, i32) {
    %c0_i32 = arith.constant 0 : i32
    %c0_i32_0 = arith.constant 0 : i32
    %c0_i32_1 = arith.constant 0 : i32
    return %c0_i32, %c0_i32_0 : i32, i32
  }
  func.func @transform_2(%arg0: i32) -> (i32, i32) {
    %c0_i32 = arith.constant 0 : i32
    %c0_i32_0 = arith.constant 0 : i32
    %c0_i32_1 = arith.constant 0 : i32
    return %c0_i32, %c0_i32_0 : i32, i32
  }
  func.func @transform_3(%arg0: i32) -> (i32, i32) {
    %c0_i32 = arith.constant 0 : i32
    %c0_i32_0 = arith.constant 0 : i32
    %c0_i32_1 = arith.constant 0 : i32
    return %c0_i32, %c0_i32_0 : i32, i32
  }
  func.func @transform_4(%arg0: i32) -> (i32, i32) {
    %c0_i32 = arith.constant 0 : i32
    %c0_i32_0 = arith.constant 0 : i32
    %c0_i32_1 = arith.constant 0 : i32
    return %c0_i32, %c0_i32_0 : i32, i32
  }
  func.func @transform_5(%arg0: i32) -> (i32, i32) {
    %c0_i32 = arith.constant 0 : i32
    %c0_i32_0 = arith.constant 0 : i32
    return %arg0, %c0_i32 : i32, i32
  }
}

</mosaic_0001>

<bundles_post_ra>
// kernel: tpu_custom_call.1
= control target key start
LH: loop header
LB: loop body
LE: loop exit
PB: predicated region body
PF: predicated region fallthrough
CT: control target
= control target key end

     0   :  { %10 = vsyncpa [#allocation3], 0  ;;  %s2067_s0 = inlined_call_operand.hbm [shape: f32[128,128], index: 0, kind: input, shape index: {}]   ;;  %s2068_s1 = inlined_call_operand.hbm [shape: bf16[128,384], index: 1, kind: input, shape index: {}]   ;;  %s2069_s2 = inlined_call_operand.hbm [shape: f32[1,384], index: 2, kind: input, shape index: {}]   ;;  %s2070_s3 = inlined_call_operand.hbm [shape: bf16[128,128], index: 3, kind: input, shape index: {}]   ;;  %s2071_s4 = inlined_call_operand.vmem [shape: f32[1,128], index: 4, kind: input, shape index: {}]   ;;  %s2072_s5 = inlined_call_operand.hbm [shape: f32[128,128], index: 5, kind: output, shape index: {}]  }
   0x1   :  { %12 = vsyncpa [#allocation3 + $0x1], 0 }
   0x2   :  { %13 = vsyncpa [#allocation6], 0 }
   0x3   :  { %14 = vsyncpa [#allocation9], 0 }
   0x4   :  { %15 = vsyncpa [#allocation4], 0 }
   0x5   :  { %17 = vsyncpa [#allocation4 + $0x1], 0  ;;  %s1642_s18 = smov 0   ;;  %s1644_s19 = smov 0  }
   0x6   :  { %s1646_s20 = smov 0   ;;  %s1648_s21 = smov 0  }
   0x7 LB: > { %s1663_s22 = sadd.s32 4294967295, %s1599_s21   ;;  %s1073_s23 = sadd.s32 4294967294, %s1599_s21   ;;  %s1599_s21 = sphi %s1648_s21, %s2101_s21   ;;  %s1595_s20 = sphi %s1646_s20, %s2100_s20   ;;  %s1591_s19 = sphi %s1644_s19, %s2099_s19   ;;  %s1587_s18 = sphi %s1642_s18, %s2098_s18  }
   0x8   : > { %p43_p0 = scmp.ne.s32.totalorder %s1591_s19, %s1587_s18  ;;  %p44_p1 = scmp.eq.s32.totalorder %s1663_s22, 0 }
   0x9   : > { %p151_p2 = scmp.eq.s32.totalorder %s1663_s22, 1  ;;  %p157_p3 = scmp.eq.s32.totalorder %s1073_s23, 1 }
   0xa   : > { %p1672_p4 = por %p44_p1, %p43_p0  ;;  %p1074_p5 = scmp.ge.s32.totalorder %s1599_s21, 1 }
   0xb   : > { %p1677_p6 = por %p157_p3, %p43_p0  ;;  %p164_p7 = scmp.lt.s32.totalorder %s1599_s21, 3 }
   0xc   : > { %s175_s28 = sshll.u32 %s2068_s1, 4  ;;  %s1601_s30 = smov [#allocation5]   ;;  %s176_s28 = int_to_ptr.hbm [resolvable:$true] %s175_s28 }
   0xd   : > { %p1685_p8 = pnand %p1074_p5, %p164_p7  ;;  %s177_s6 = sshll.u32 %s1601_s30, 4  ;;  %s178_s6 = int_to_ptr.vmem [resolvable:$true] %s177_s6 }
   0xe   : > { %s190_s10 = sshll.u32 %s2069_s2, 4  ;;  %s1602_s11 = smov 192   ;;  %s191_s10 = int_to_ptr.hbm [resolvable:$true] %s190_s10 }
   0xf   : > { %p1279_p9 = pneg %p1685_p8  ;;  %s1603_s12 = smov 12  }
  0x10   : > { %s1604_s13 = smov [#allocation7]   ;;  %s201_s17 = sshll.u32 %s2070_s3, 4  ;;  %s202_s17 = int_to_ptr.hbm [resolvable:$true] %s201_s17 }
  0x11   : > { %p1693_p10 = pnand %p1279_p9, %p44_p1  ;;  %s192_s14 = sshll.u32 %s1604_s13, 4  ;;  %s193_s14 = int_to_ptr.vmem [resolvable:$true] %s192_s14 }
  0x12   : > { %s1605_s23 = smov [#allocation8]   ;;  %s1606_s27 = smov 64  }
  0x13   : > { %1282 = dma.hbm_to_vmem [thread:$0]  (!%p1693_p10), %s176_s28, 3072, %s178_s6, [#allocation6], %s1602_s11, %s1602_s11, %s1603_s12  }
  0x14   : > { %1285 = dma.hbm_to_vmem [thread:$0]  (!%p1693_p10), %s191_s10, 48, %s193_s14, [#allocation6]  }
  0x15   : > { %s203_s26 = sshll.u32 %s1605_s23, 4  ;;  %s1607_s28 = smov 4   ;;  %s204_s26 = int_to_ptr.vmem [resolvable:$true] %s203_s26 }
  0x16   : > { %1288 = dma.hbm_to_vmem [thread:$0]  (!%p1693_p10), %s202_s17, 1024, %s204_s26, [#allocation9], %s1606_s27, %s1606_s27, %s1607_s28  }
  0x17   : > { %s1711_s30 = sadd.s32 1, %s1599_s21   ;;  %s30_s8 = sadd.s32 1, %s1595_s20 }
  0x18   : > { %s27_s6 = ssub.s32 %s1599_s21, %s1711_s30  ;;  %p37_p13 = scmp.ne.s32.totalorder %s1595_s20, %s1591_s19 }
  0x19   : > { %p28_p12 = scmp.eq.s32.totalorder %s27_s6, 0  ;;  %p38_p0 = scmp.eq.s32.totalorder %s1599_s21, 0 }
  0x1a   : > { %p1300_p3 = scmp.lt.s32.totalorder %s1599_s21, 2  ;;  %p1725_p7 = por %p151_p2, %p37_p13 }
  0x1b   : > { %s1721_s9 = scalar_select %p28_p12, %s1595_s20, %s30_s8  }
  0x1c   : > { %p39_p5 = por %p38_p0, %p37_p13  ;;  %s220_s7 = sand.u32 1, %s1595_s20  }
  0x1d   : > { %s1229_s11 = sshll.u32 %s1599_s21, 6  ;;  %s1079_s12 = sshll.u32 %s220_s7, 6 }
  0x1e   : > { %s229_s15 = scalar_lea.hbm %s2067_s0, %s1229_s11  ;;  %s224_s17 = scalar_lea.vmem [#allocation2], %s1079_s12 }
  0x1f   : > { %s230_s16 = sshll.u32 %s229_s15, 4  ;;  %s232_s23 = sshll.u32 %s224_s17, 4  ;;  %s231_s16 = int_to_ptr.hbm [resolvable:$true] %s230_s16  ;;  %s233_s23 = int_to_ptr.vmem [resolvable:$true] %s232_s23 }
  0x20   : > { %p1736_p9 = pnand %p1300_p3, %p39_p5  ;;  %s221_s27 = scalar_lea.sflag [#allocation3], %s220_s7 }
  0x21   : > { %s1495_s28 = sshra.s32 %s231_s16, 4  ;;  %s1502_s12 = scalar_lea.hbm %s2067_s0, 128  ;;  %s1496_s28 = int_to_ptr.hbm [resolvable:$true] %s1495_s28 }
  0x22   : > { %s1497_s6 = scalar_lea.hbm %s1496_s28, 64  ;;  %p1499_p10 = pneg %p1736_p9 }
  0x23   : > { %p1498_p2 = scmp.ne.s32.totalorder %s1496_s28, %s1497_s6  ;;  %p1503_p0 = scmp.lt.s32.totalorder %s1496_s28, %s2067_s0 }
  0x24   : > { %p1504_p3 = scmp.lt.s32.totalorder %s1502_s12, %s1497_s6 }
  0x25   : > { %p1500_p12 = pnand %p1499_p10, %p1498_p2 }
  0x26   : > { %p1505_p5 = por %p1504_p3, %p1503_p0 }
  0x27   : > { %p1501_p13 = pneg %p1500_p12 }
  0x29   : > { %p1506_p11 = pnand %p1505_p5, %p1501_p13 }
  0x2b   : > { %1509 = shalt.err (!%p1506_p11)
}
  0x2c   : > { %s1608_s7 = smov 128   ;;  %s1609_s15 = smov 8  }
  0x2d   : > { %1292 = dma.hbm_to_vmem [thread:$0]  (!%p1736_p9), %s231_s16, 1024, %s233_s23, %s221_s27, %s1608_s7, %s1608_s7, %s1609_s15  }
  0x2e   : > { %244 = sbr.rel (%p1685_p8) target bundleno = 475 (0x1db), region = 40  ;;  %s1753_s17 = sand.u32 (!%p1685_p8), 1, %s1591_s19  }
  0x2f   : > { %s1083_s28 = sshll.u32 (!%p1685_p8), %s1753_s17, 6  ;;  %s247_s6 = scalar_lea.sflag (!%p1685_p8), [#allocation3], %s1753_s17 }
  0x30   : > { %s1759_s8 = scalar_lea.vmem (!%p1685_p8), [#allocation2], %s1083_s28 }
  0x33   : > { %1570 = dma.done.wait (%p1672_p4), %s247_s6, 1024  }
  0x34   : > { %1572 = vsyncadd (%p1672_p4), %s247_s6, 4294966272 }
  0x35   : > { %1574 = dma.done.wait (%p44_p1), [#allocation6], 3120  }
  0x36   : > { %1576 = vsyncadd (%p44_p1), [#allocation6], 4294964176 }
  0x37   : > { %1578 = dma.done.wait (%p44_p1), [#allocation9], 1024  }
  0x38   : > { %1580 = vsyncadd (%p44_p1), [#allocation9], 4294966272  ;;  %v1174_v0 = vld [vmem:[#allocation5 + $0xa8] sm:$0xf]  ;;  %v1252_v1 = vld [vmem:[#allocation5 + $0xb0] sm:$0xf0] }
  0x39   : > { %v1182_v2 = vld [vmem:[#allocation5 + $0xb0] sm:$0xf]  ;;  %v1175_v3 = vor.u32 %v1252_v1, %v1174_v0  ;;  %v1253_v4 = vld [vmem:[#allocation5 + $0xb8] sm:$0xf0]  ;;  %v1170_v8 = vld [vmem:[#allocation5 + $0x98] sm:$0xf] }
  0x3a   : > { %v1162_v5 = vld [vmem:[#allocation5 + $0x90] sm:$0xf]  ;;  %v1249_v6 = vld [vmem:[#allocation5 + $0x98] sm:$0xf0]  ;;  %v1183_v7 = vor.u32 %v1253_v4, %v1182_v2  ;;  %v1250_v9 = vld [vmem:[#allocation5 + $0xa0] sm:$0xf0] }
  0x3b   : > { %475 = vmatpush.bf16.msra.mxu0 %v1175_v3  ;;  %v1163_v10 = vor.u32 %v1249_v6, %v1162_v5  ;;  %v1171_v11 = vor.u32 %v1250_v9, %v1170_v8  ;;  %v1150_v12 = vld [vmem:[#allocation5 + $0x78] sm:$0xf]  ;;  %v1246_v13 = vld [vmem:[#allocation5 + $0x80] sm:$0xf0]  ;;  %v1158_v14 = vld [vmem:[#allocation5 + $0x80] sm:$0xf] }
  0x3c   : > { %533 = vmatpush.bf16.msra.mxu2 %v1183_v7  ;;  %v1247_v15 = vld [vmem:[#allocation5 + $0x88] sm:$0xf0]  ;;  %v1151_v16 = vor.u32 %v1246_v13, %v1150_v12  ;;  %v1138_v17 = vld [vmem:[#allocation5 + $0x60] sm:$0xf]  ;;  %v1176_v21 = vld [vmem:[#allocation5 + $0xb4] sm:$0xf0] }
  0x3d   : > { %v1159_v18 = vor.u32 %v1247_v15, %v1158_v14  ;;  %v1243_v19 = vld [vmem:[#allocation5 + $0x68] sm:$0xf0]  ;;  %v1146_v22 = vld [vmem:[#allocation5 + $0x68] sm:$0xf]  ;;  %v1244_v23 = vld [vmem:[#allocation5 + $0x70] sm:$0xf0] }
  0x3e   : > { %v1251_v20 = vld [vmem:[#allocation5 + $0xac] sm:$0xf]  ;;  %v1248_v25 = vld [vmem:[#allocation5 + $0x94] sm:$0xf]  ;;  %v1164_v26 = vld [vmem:[#allocation5 + $0x9c] sm:$0xf0]  ;;  %v1139_v27 = vor.u32 %v1243_v19, %v1138_v17  ;;  %v1147_v30 = vor.u32 %v1244_v23, %v1146_v22 }
  0x3f   : > { %476 = vmatpush.bf16.msra.mxu0 %v1163_v10  ;;  %v1179_v24 = vor.u32 %v1251_v20, %v1176_v21  ;;  %v1126_v28 = vld [vmem:[#allocation5 + $0x48] sm:$0xf]  ;;  %v1167_v29 = vor.u32 %v1248_v25, %v1164_v26  ;;  %v1240_v31 = vld [vmem:[#allocation5 + $0x50] sm:$0xf0]  ;;  %v1245_v32 = vld [vmem:[#allocation5 + $0x7c] sm:$0xf] }
  0x40   : > { %534 = vmatpush.bf16.msra.mxu2 %v1171_v11  ;;  %v1152_v33 = vld [vmem:[#allocation5 + $0x84] sm:$0xf0]  ;;  %v1134_v34 = vld [vmem:[#allocation5 + $0x50] sm:$0xf]  ;;  %v1241_v35 = vld [vmem:[#allocation5 + $0x58] sm:$0xf0]  ;;  %v1127_v36 = vor.u32 %v1240_v31, %v1126_v28 }
  0x41   : > { %504 = vmatpush.bf16.msra.mxu1 %v1179_v24  ;;  %v1114_v37 = vld [vmem:[#allocation5 + $0x30] sm:$0xf]  ;;  %v1237_v38 = vld [vmem:[#allocation5 + $0x38] sm:$0xf0]  ;;  %v1155_v39 = vor.u32 %v1245_v32, %v1152_v33  ;;  %v1135_v40 = vor.u32 %v1241_v35, %v1134_v34  ;;  %v1242_v41 = vld [vmem:[#allocation5 + $0x64] sm:$0xf] }
  0x42   : > { %v1140_v42 = vld [vmem:[#allocation5 + $0x6c] sm:$0xf0]  ;;  %v1122_v43 = vld [vmem:[#allocation5 + $0x38] sm:$0xf]  ;;  %v1238_v44 = vld [vmem:[#allocation5 + $0x40] sm:$0xf0]  ;;  %v1115_v45 = vor.u32 %v1237_v38, %v1114_v37 }
  0x43   : > { %477 = vmatpush.bf16.msra.mxu0 %v1151_v16  ;;  %v1102_v46 = vld [vmem:[#allocation5 + $0x18] sm:$0xf]  ;;  %v1143_v47 = vor.u32 %v1242_v41, %v1140_v42  ;;  %v1123_v48 = vor.u32 %v1238_v44, %v1122_v43  ;;  %v1234_v49 = vld [vmem:[#allocation5 + $0x20] sm:$0xf0]  ;;  %v1239_v50 = vld [vmem:[#allocation5 + $0x4c] sm:$0xf] }
  0x44   : > { %535 = vmatpush.bf16.msra.mxu2 %v1159_v18  ;;  %v1128_v51 = vld [vmem:[#allocation5 + $0x54] sm:$0xf0]  ;;  %v1110_v52 = vld [vmem:[#allocation5 + $0x20] sm:$0xf]  ;;  %v1235_v53 = vld [vmem:[#allocation5 + $0x28] sm:$0xf0]  ;;  %v1103_v54 = vor.u32 %v1234_v49, %v1102_v46 }
  0x45   : > { %505 = vmatpush.bf16.msra.mxu1 %v1167_v29  ;;  %v1090_v55 = vld [vmem:[#allocation5] sm:$0xf]  ;;  %v1131_v56 = vor.u32 %v1239_v50, %v1128_v51  ;;  %v1111_v57 = vor.u32 %v1235_v53, %v1110_v52  ;;  %v1231_v58 = vld [vmem:[#allocation5 + $0x8] sm:$0xf0]  ;;  %v1236_v59 = vld [vmem:[#allocation5 + $0x34] sm:$0xf] }
  0x46   : > { %v1116_v60 = vld [vmem:[#allocation5 + $0x3c] sm:$0xf0]  ;;  %v1098_v61 = vld [vmem:[#allocation5 + $0x8] sm:$0xf]  ;;  %v1232_v62 = vld [vmem:[#allocation5 + $0x10] sm:$0xf0]  ;;  %v1091_v63 = vor.u32 %v1231_v58, %v1090_v55 }
  0x47   : > { %478 = vmatpush.bf16.msra.mxu0 %v1139_v27  ;;  %v295_v0 = vld [vmem:[%s1759_s8] sm:$0xff]  ;;  %v296_v1 = vld [vmem:[%s1759_s8 + $0x8] sm:$0xff]  ;;  %v1119_v2 = vor.u32 %v1236_v59, %v1116_v60  ;;  %v1099_v3 = vor.u32 %v1232_v62, %v1098_v61  ;;  %v1233_v4 = vld [vmem:[#allocation5 + $0x1c] sm:$0xf]  ;;  %s292_s16 = scalar_lea.vmem [#allocation10], %s1083_s28  ;;  %s1262_s23 = sshll.u32 %s1663_s22, 6 }
  0x48   : > { %536 = vmatpush.bf16.msra.mxu2 %v1147_v30  ;;  %v1104_v5 = vld [vmem:[#allocation5 + $0x24] sm:$0xf0]  ;;  %v303_v6 = vpack.c.bf16 %v296_v1, %v295_v0  ;;  %v1230_v8 = vld [vmem:[#allocation5 + $0x4] sm:$0xf]  ;;  %v1092_v9 = vld [vmem:[#allocation5 + $0xc] sm:$0xf0]  ;;  %s967_s11 = scalar_lea.hbm %s2072_s5, %s1262_s23 }
  0x49   : > { %506 = vmatpush.bf16.msra.mxu1 %v1155_v39  ;;  %v1107_v7 = vor.u32 %v1233_v4, %v1104_v5  ;;  %v1095_v10 = vor.u32 %v1230_v8, %v1092_v9  ;;  %v297_v11 = vld [vmem:[%s1759_s8 + $0x10] sm:$0xff]  ;;  %v298_v12 = vld [vmem:[%s1759_s8 + $0x18] sm:$0xff]  ;;  %v299_v14 = vld [vmem:[%s1759_s8 + $0x20] sm:$0xff]  ;;  %s968_s12 = sshll.u32 %s292_s16, 4  ;;  %s970_s13 = sshll.u32 %s967_s11, 4  ;;  %s969_s12 = int_to_ptr.vmem [resolvable:$true] %s968_s12  ;;  %s971_s13 = int_to_ptr.hbm [resolvable:$true] %s970_s13 }
  0x4a   : > { %v304_v13 = vpack.c.bf16 %v298_v12, %v297_v11  ;;  %v300_v15 = vld [vmem:[%s1759_s8 + $0x28] sm:$0xff]  ;;  %v301_v17 = vld [vmem:[%s1759_s8 + $0x30] sm:$0xff]  ;;  %v302_v18 = vld [vmem:[%s1759_s8 + $0x38] sm:$0xff]  ;;  %s956_s14 = scalar_lea.sflag [#allocation4], %s1753_s17  ;;  %s1539_s7 = sshra.s32 %s971_s13, 4  ;;  %s1540_s7 = int_to_ptr.hbm [resolvable:$true] %s1539_s7 }
  0x4b   : > { %479 = vmatpush.bf16.msra.mxu0 %v1127_v36  ;;  %v305_v16 = vpack.c.bf16 %v300_v15, %v299_v14  ;;  %v306_v19 = vpack.c.bf16 %v302_v18, %v301_v17  ;;  %v1261_v21 = vld [vmem:[#allocation8 + $0x38] sm:$0xff]  ;;  %v1260_v25 = vld [vmem:[#allocation8 + $0x30] sm:$0xff]  ;;  %v1259_v31 = vld [vmem:[#allocation8 + $0x28] sm:$0xff]  ;;  %s1541_s15 = scalar_lea.hbm %s1540_s7, 64  ;;  %s1545_s6 = scalar_lea.hbm %s2072_s5, 128 }
  0x4c   : > { %537 = vmatpush.bf16.msra.mxu2 %v1135_v40  ;;  %v339_v22 = vld [vmem:[#allocation7] sm:$0x7]  ;;  %918 = vmatpush.bf16.msra.mxu3 %v1261_v21  ;;  %v1258_v36 = vld [vmem:[#allocation8 + $0x20] sm:$0xff]  ;;  %v1256_v49 = vld [vmem:[#allocation8 + $0x10] sm:$0xff]  ;;  %p1542_p1 = scmp.ne.s32.totalorder %s1540_s7, %s1541_s15  ;;  %p1546_p11 = scmp.lt.s32.totalorder %s1540_s7, %s2072_s5 }
  0x4d   : > { %507 = vmatpush.bf16.msra.mxu1 %v1143_v47  ;;  %v1781_v23 = vperm.slane %v339_v22, 2  ;;  %v1783_v24 = vperm.slane %v339_v22, 0  ;;  %v1257_v42 = vld [vmem:[#allocation8 + $0x18] sm:$0xff]  ;;  %v1255_v58 = vld [vmem:[#allocation8 + $0x8] sm:$0xff]  ;;  %v1805_v4 = vperm.slane %v339_v22, 1  ;;  %p1547_p9 = scmp.lt.s32.totalorder %s1545_s6, %s1541_s15 }
  0x4e   : > { %p1543_p4 = pnand %p1542_p1, %p1725_p7 }
  0x4f   : > { %480 = vmatpush.bf16.msra.mxu0 %v1115_v45  ;;  %p1548_p2 = por %p1547_p9, %p1546_p11 }
  0x50   : > { %538 = vmatpush.bf16.msra.mxu2 %v1123_v48  ;;  %919 = vmatpush.bf16.msra.mxu3 %v1260_v25  ;;  %p1544_p8 = pneg %p1543_p4 }
  0x51   : > { %508 = vmatpush.bf16.msra.mxu1 %v1131_v56 }
  0x52   : > { %p1549_p10 = pnand %p1548_p2, %p1544_p8 }
  0x53   : > { %481 = vmatpush.bf16.msra.mxu0 %v1103_v54 }
  0x54   : > { %539 = vmatpush.bf16.msra.mxu2 %v1111_v57  ;;  %920 = vmatpush.bf16.msra.mxu3 %v1259_v31 }
  0x55   : > { %509 = vmatpush.bf16.msra.mxu1 %v1119_v2 }
  0x57   : > { %482 = vmatpush.bf16.msra.mxu0 %v1091_v63 }
  0x58   : > { %540 = vmatpush.bf16.msra.mxu2 %v1099_v3  ;;  %921 = vmatpush.bf16.msra.mxu3 %v1258_v36  ;;  %v1254_v3 = vld [vmem:[#allocation8] sm:$0xff] }
  0x59   : > { %510 = vmatpush.bf16.msra.mxu1 %v1107_v7 }
  0x5a   : > { %483 = vmatmul.bf16.vlgmr.msra.gmra.mxu0 %v303_v6 }
  0x5b   : > { %541 = vmatmul.bf16.vlgmr.msra.gmra.mxu2 %v303_v6 }
  0x5c   : > { %922 = vmatpush.bf16.msra.mxu3 %v1257_v42 }
  0x5d   : > { %511 = vmatpush.bf16.msra.mxu1 %v1095_v10 }
  0x60   : > { %512 = vmatmul.bf16.vlgmr.msra.gmra.mxu1 %v303_v6  ;;  %923 = vmatpush.bf16.msra.mxu3 %v1256_v49 }
  0x64   : > { %924 = vmatpush.bf16.msra.mxu3 %v1255_v58 }
  0x68   : > { %925 = vmatpush.bf16.msra.mxu3 %v1254_v3 }
  0x6a   : > { %488 = vmatmul.bf16.gmra.mxu0 %v304_v13 }
  0x6b   : > { %546 = vmatmul.bf16.gmra.mxu2 %v304_v13 }
  0x70   : > { %517 = vmatmul.bf16.gmra.mxu1 %v304_v13 }
  0x7a   : > { %493 = vmatmul.bf16.gmra.mxu0 %v305_v16 }
  0x7b   : > { %551 = vmatmul.bf16.gmra.mxu2 %v305_v16 }
  0x80   : > { %522 = vmatmul.bf16.gmra.mxu1 %v305_v16 }
  0x8a   : > { %498 = vmatmul.bf16.gmra.mxu0 %v306_v19 }
  0x8b   : > { %556 = vmatmul.bf16.gmra.mxu2 %v306_v19 }
  0x90   : > { %527 = vmatmul.bf16.gmra.mxu1 %v306_v19 }
  0xd7   : > { %v484_v20 = vpop.f32.mrf.mxu0 }
  0xd8   : > { %v485_v29 = vadd.f32 %v484_v20, %v1783_v24 }
  0xdd   : > { %v513_v33 = vpop.f32.mrf.mxu1 }
  0xde   : > { %v542_v26 = vpop.f32.mrf.mxu2  ;;  %v514_v13 = vadd.f32 %v513_v33, %v1805_v4 }
  0xdf   : > { %v543_v27 = vadd.f32 %v542_v26, %v1781_v23  ;;  %v486_v28 = vpop.f32.mrf.mxu0 }
  0xe0   : > { %v487_v30 = vadd.f32 %v486_v28, %v1783_v24 }
  0xe1   : > { %v1184_v32 = vmul.f32 -1.442695, %v543_v27 }
  0xe2   : > { %v562_v34 = vmax.f32 %v485_v29, %v487_v30 }
  0xe3   : > { %1349 = vpow2.f32 %v1184_v32 }
  0xe4   : > { %v563_v35 = vrot.slane %v562_v34, 4 }
  0xe5   : > { %v515_v47 = vpop.f32.mrf.mxu1 }
  0xe6   : > { %v564_v37 = vmax.f32 %v562_v34, %v563_v35  ;;  %v544_v38 = vpop.f32.mrf.mxu2  ;;  %v516_v19 = vadd.f32 %v515_v47, %v1805_v4 }
  0xe7   : > { %v545_v39 = vadd.f32 %v544_v38, %v1781_v23  ;;  %v489_v40 = vpop.f32.mrf.mxu0 }
  0xe8   : > { %v565_v41 = vrot.slane %v564_v37, 2  ;;  %v1794_v56 = vadd.f32 %v489_v40, %v1783_v24 }
  0xe9   : > { %v1350_v43 = vpop.eup %1349  ;;  %v1185_v44 = vmul.f32 -1.442695, %v545_v39 }
  0xea   : > { %v1789_v45 = vadd.f32 1.0, %v1350_v43  ;;  %v566_v46 = vmax.f32 %v564_v37, %v565_v41 }
  0xeb   : > { %1351 = vpow2.f32 %v1185_v44 }
  0xec   : > { %v567_v48 = vrot.slane %v566_v46, 1  ;;  %1353 = vrcp.f32 %v1789_v45  ;;  %v729_v15 = vand.u32 2147483648, %v1789_v45  ;;  %v727_v25 = vand.u32 2147483647, %v1789_v45 }
  0xed   : > { %v1807_v5 = vpop.f32.mrf.mxu1  ;;  %vm723_vm0 = vweird.f32 %v1789_v45 }
  0xee   : > { %v568_v50 = vmax.f32 %v566_v46, %v567_v48  ;;  %v547_v51 = vpop.f32.mrf.mxu2  ;;  %vm1830_vm2 = vcmp.eq.f32.partialorder %v727_v25, 8.507059e+37 }
  0xef   : > { %v548_v52 = vadd.f32 %v547_v51, %v1781_v23  ;;  %v491_v53 = vpop.f32.mrf.mxu0 }
  0xf0   : > { %v590_v54 = vsub.f32 %v485_v29, %v568_v50  ;;  %v591_v55 = vsub.f32 %v487_v30, %v568_v50  ;;  %v1797_v57 = vadd.f32 %v491_v53, %v1783_v24  ;;  %v1823_v30 = vor.u32 1.1754944e-38, %v729_v15 }
  0xf1   : > { %v1352_v59 = vpop.eup %1351  ;;  %v1186_v60 = vmul.f32 -1.442695, %v548_v52 }
  0xf2   : > { %v598_v61 = vmul.f32 1.442695, %v590_v54  ;;  %v600_v62 = vmul.f32 1.442695, %v591_v55  ;;  %v1799_v63 = vadd.f32 1.0, %v1352_v59  ;;  %v569_v0 = vmax.f32 %v1794_v56, %v1797_v57  ;;  %v1803_v1 = vpop.eup %1353 }
  0xf3   : > { %1355 = vpow2.f32 %v1186_v60  ;;  %v719_v10 = vmul.f32 %v1803_v1, %v1789_v45  ;;  %vm724_vm1 = vweird.f32 %v1803_v1 }
  0xf4   : > { %1357 = vpow2.f32 %v598_v61  ;;  %v570_v2 = vrot.slane %v569_v0, 4  ;;  %vm738_vm3 = vweird.f32 %v1799_v63  ;;  %vm1855_vm4 = vmor %vm723_vm0, %vm724_vm1  ;;  %v744_v3 = vand.u32 2147483648, %v1799_v63 }
  0xf5   : > { %1359 = vpow2.f32 %v600_v62  ;;  %v720_v22 = vsub.f32 1.0, %v719_v10  ;;  %v520_v38 = vpop.f32.mrf.mxu1 }
  0xf6   : > { %1361 = vrcp.f32 %v1799_v63  ;;  %v571_v6 = vmax.f32 %v569_v0, %v570_v2  ;;  %v549_v7 = vpop.f32.mrf.mxu2  ;;  %v742_v0 = vand.u32 2147483647, %v1799_v63 }
  0xf7   : > { %v550_v8 = vadd.f32 %v549_v7, %v1781_v23  ;;  %v494_v9 = vpop.f32.mrf.mxu0  ;;  %v721_v39 = vmul.f32 %v1803_v1, %v720_v22 }
  0xf8   : > { %v572_v11 = vrot.slane %v571_v6, 2  ;;  %v1838_v48 = vadd.f32 %v494_v9, %v1783_v24  ;;  %vm1872_vm6 = vcmp.eq.f32.partialorder %v742_v0, 8.507059e+37 }
  0xf9   : > { %v1356_v12 = vpop.eup %1355  ;;  %v1187_v14 = vmul.f32 -1.442695, %v550_v8  ;;  %v722_v59 = vadd.f32 %v1803_v1, %v721_v39 }
  0xfa   : > { %v1358_v16 = vpop.eup %1357  ;;  %v1815_v17 = vadd.f32 1.0, %v1356_v12  ;;  %v573_v18 = vmax.f32 %v571_v6, %v572_v11 }
  0xfb   : > { %v1360_v20 = vpop.eup %1359  ;;  %v642_v21 = vmul.f32 %v1358_v16, %v514_v13  ;;  %1363 = vpow2.f32 %v1187_v14  ;;  %v726_v13 = vsel %vm1855_vm4, %v1803_v1, %v722_v59  ;;  %v519_v14 = vadd.f32 %v1807_v5, %v1805_v4 }
  0xfc   : > { %v1819_v26 = vpop.eup %1361  ;;  %v614_v27 = vadd.f32 %v1360_v20, %v1358_v16  ;;  %v574_v28 = vrot.slane %v573_v18, 1  ;;  %v643_v29 = vmul.f32 %v1360_v20, %v516_v19  ;;  %1365 = vrcp.f32 %v1815_v17 }
  0xfd   : > { %v734_v31 = vmul.f32 %v1819_v26, %v1799_v63  ;;  %vm739_vm5 = vweird.f32 %v1819_v26  ;;  %v521_v20 = vadd.f32 %v520_v38, %v1805_v4  ;;  %v523_v22 = vpop.f32.mrf.mxu1  ;;  %v745_v5 = vor.u32 1.1754944e-38, %v744_v3 }
  0xfe   : > { %v615_v32 = vrot.slane %v614_v27, 4  ;;  %v575_v33 = vmax.f32 %v573_v18, %v574_v28  ;;  %v650_v34 = vadd.f32 %v643_v29, %v642_v21  ;;  %v552_v35 = vpop.f32.mrf.mxu2  ;;  %vm1881_vm7 = vmor %vm738_vm3, %vm739_vm5  ;;  %vm753_vm8 = vweird.f32 %v1815_v17 }
  0xff   : > { %v553_v36 = vadd.f32 %v552_v35, %v1781_v23  ;;  %v496_v37 = vpop.f32.mrf.mxu0  ;;  %v735_v41 = vsub.f32 1.0, %v734_v31  ;;  %v759_v39 = vand.u32 2147483648, %v1815_v17 }
 0x100   : > { %v616_v42 = vadd.f32 %v615_v32, %v614_v27  ;;  %v592_v43 = vsub.f32 %v1794_v56, %v575_v33  ;;  %v593_v44 = vsub.f32 %v1797_v57, %v575_v33  ;;  %v651_v46 = vrot.slane %v650_v34, 4 }
 0x101   : > { %v1364_v47 = vpop.eup %1363  ;;  %v1188_v49 = vmul.f32 -1.442695, %v553_v36  ;;  %v1841_v50 = vadd.f32 %v496_v37, %v1783_v24  ;;  %v736_v51 = vmul.f32 %v1819_v26, %v735_v41  ;;  %v731_v27 = vsel %vm1830_vm2, %v1823_v30, %v726_v13 }
 0x102   : > { %v617_v52 = vrot.slane %v616_v42, 2  ;;  %v602_v53 = vmul.f32 1.442695, %v592_v43  ;;  %v604_v54 = vmul.f32 1.442695, %v593_v44  ;;  %v652_v55 = vadd.f32 %v651_v46, %v650_v34  ;;  %v1844_v58 = vpop.eup %1365 }
 0x103   : > { %v1846_v56 = vadd.f32 1.0, %v1364_v47  ;;  %1367 = vpow2.f32 %v1188_v49  ;;  %v576_v57 = vmax.f32 %v1838_v48, %v1841_v50  ;;  %v737_v8 = vadd.f32 %v1819_v26, %v736_v51 }
 0x104   : > { %v618_v60 = vadd.f32 %v617_v52, %v616_v42  ;;  %1369 = vpow2.f32 %v602_v53  ;;  %v653_v61 = vrot.slane %v652_v55, 2  ;;  %v749_v45 = vmul.f32 %v1844_v58, %v1815_v17 }
 0x105   : > { %1371 = vpow2.f32 %v604_v54  ;;  %v577_v2 = vrot.slane %v576_v57, 4  ;;  %v741_v28 = vsel %vm1881_vm7, %v1819_v26, %v737_v8  ;;  %v757_v30 = vand.u32 2147483647, %v1815_v17 }
 0x106   : > { %1373 = vrcp.f32 %v1846_v56  ;;  %v554_v6 = vpop.f32.mrf.mxu2  ;;  %v619_v7 = vrot.slane %v618_v60, 1  ;;  %v654_v9 = vadd.f32 %v653_v61, %v652_v55  ;;  %v750_v29 = vsub.f32 1.0, %v749_v45 }
 0x107   : > { %v578_v10 = vmax.f32 %v576_v57, %v577_v2  ;;  %v555_v11 = vadd.f32 %v554_v6, %v1781_v23  ;;  %v499_v12 = vpop.f32.mrf.mxu0  ;;  %v746_v26 = vsel %vm1872_vm6, %v745_v5, %v741_v28  ;;  %vm754_vm9 = vweird.f32 %v1844_v58 }
 0x108   : > { %v620_v15 = vadd.f32 %v619_v7, %v618_v60  ;;  %v655_v63 = vrot.slane %v654_v9, 1  ;;  %v1902_v42 = vadd.f32 %v499_v12, %v1783_v24  ;;  %v751_v52 = vmul.f32 %v1844_v58, %v750_v29  ;;  %vm1926_vm10 = vmor %vm753_vm8, %vm754_vm9 }
 0x109   : > { %v1368_v18 = vpop.eup %1367  ;;  %v579_v19 = vrot.slane %v578_v10, 2  ;;  %v1189_v21 = vmul.f32 -1.442695, %v555_v11  ;;  %vm1933_vm11 = vcmp.eq.f32.partialorder %v757_v30, 8.507059e+37  ;;  %v760_v29 = vor.u32 1.1754944e-38, %v759_v39 }
 0x10a   : > { %v1370_v25 = vpop.eup %1369  ;;  %1375 = vrcp.f32 %v620_v15  ;;  %v1894_v36 = vadd.f32 1.0, %v1368_v18  ;;  %v656_v51 = vadd.f32 %v655_v63, %v654_v9  ;;  %vm768_vm12 = vweird.f32 %v1846_v56 }
 0x10b   : > { %v1372_v31 = vpop.eup %1371  ;;  %v644_v32 = vmul.f32 %v1370_v25, %v519_v14  ;;  %v580_v33 = vmax.f32 %v578_v10, %v579_v19  ;;  %1377 = vpow2.f32 %v1189_v21  ;;  %v525_v10 = vpop.f32.mrf.mxu1  ;;  %v752_v14 = vadd.f32 %v1844_v58, %v751_v52 }
 0x10c   : > { %v1892_v34 = vpop.eup %1373  ;;  %v621_v35 = vadd.f32 %v1372_v31, %v1370_v25  ;;  %v645_v37 = vmul.f32 %v1372_v31, %v521_v20  ;;  %1379 = vrcp.f32 %v1894_v36  ;;  %vm783_vm0 = vweird.f32 %v1894_v36 }
 0x10d   : > { %v581_v38 = vrot.slane %v580_v33, 1  ;;  %v764_v44 = vmul.f32 %v1892_v34, %v1846_v56  ;;  %v756_v31 = vsel %vm1926_vm10, %v1844_v58, %v752_v14  ;;  %vm769_vm13 = vweird.f32 %v1892_v34 }
 0x10e   : > { %v622_v40 = vrot.slane %v621_v35, 4  ;;  %v657_v41 = vadd.f32 %v645_v37, %v644_v32  ;;  %v557_v43 = vpop.f32.mrf.mxu2  ;;  %v772_v32 = vand.u32 2147483647, %v1846_v56  ;;  %v526_v37 = vadd.f32 %v525_v10, %v1805_v4  ;;  %vm1956_vm14 = vmor %vm768_vm12, %vm769_vm13 }
 0x10f   : > { %v582_v46 = vmax.f32 %v580_v33, %v581_v38  ;;  %v558_v47 = vadd.f32 %v557_v43, %v1781_v23  ;;  %v501_v49 = vpop.f32.mrf.mxu0  ;;  %v765_v7 = vsub.f32 1.0, %v764_v44  ;;  %v774_v38 = vand.u32 2147483648, %v1846_v56 }
 0x110   : > { %v1376_v53 = vpop.eup %1375  ;;  %v623_v54 = vadd.f32 %v622_v40, %v621_v35  ;;  %v658_v55 = vrot.slane %v657_v41, 4  ;;  %v1910_v57 = vadd.f32 %v501_v49, %v1783_v24  ;;  %vm773_vm15 = vcmp.eq.f32.partialorder %v772_v32, 8.507059e+37 }
 0x111   : > { %v1378_v59 = vpop.eup %1377  ;;  %v594_v60 = vsub.f32 %v1838_v48, %v582_v46  ;;  %v595_v61 = vsub.f32 %v1841_v50, %v582_v46  ;;  %v1190_v62 = vmul.f32 -1.442695, %v558_v47  ;;  %v682_v0 = vmul.f32 %v1376_v53, %v656_v51 }
 0x112   : > { %v624_v2 = vrot.slane %v623_v54, 2  ;;  %v659_v3 = vadd.f32 %v658_v55, %v657_v41  ;;  %v583_v6 = vmax.f32 %v1902_v42, %v1910_v57  ;;  %v1916_v9 = vadd.f32 1.0, %v1378_v59  ;;  %v1920_v15 = vpop.eup %1379 }
 0x113   : > { %v606_v8 = vmul.f32 1.442695, %v594_v60  ;;  %v608_v45 = vmul.f32 1.442695, %v595_v61  ;;  %v838_v24 = vmul.f32 %v731_v27, %v682_v0  ;;  %1381 = vpow2.f32 %v1190_v62  ;;  %v528_v46 = vpop.f32.mrf.mxu1 }
 0x114   : > { %v625_v11 = vadd.f32 %v624_v2, %v623_v54  ;;  %v660_v12 = vrot.slane %v659_v3, 2  ;;  %v584_v48 = vrot.slane %v583_v6, 4  ;;  %v524_v50 = vadd.f32 %v523_v22, %v1805_v4 }
 0x115   : > { %1383 = vpow2.f32 %v606_v8  ;;  %v839_v13 = vmul.f32 %v746_v26, %v682_v0  ;;  %v766_v21 = vmul.f32 %v1892_v34, %v765_v7  ;;  %v779_v40 = vmul.f32 %v1920_v15, %v1894_v36 }
 0x116   : > { %1385 = vpow2.f32 %v608_v45  ;;  %v585_v16 = vmax.f32 %v583_v6, %v584_v48  ;;  %v559_v18 = vpop.f32.mrf.mxu2  ;;  %v626_v19 = vrot.slane %v625_v11, 1  ;;  %v661_v22 = vadd.f32 %v660_v12, %v659_v3 }
 0x117   : > { %1387 = vrcp.f32 %v1916_v9  ;;  %v560_v1 = vadd.f32 %v559_v18, %v1781_v23  ;;  %v846_v5 = vpack.c.bf16 %v839_v13, %v838_v24  ;;  %v767_v63 = vadd.f32 %v1892_v34, %v766_v21 }
 0x118   : > { %v586_v25 = vrot.slane %v585_v16, 2  ;;  %v627_v27 = vadd.f32 %v626_v19, %v625_v11  ;;  %v662_v30 = vrot.slane %v661_v22, 1  ;;  %v761_v47 = vsel %vm1933_vm11, %v760_v29, %v756_v31 }
 0x119   : > { %v1191_v17 = vmul.f32 -1.442695, %v560_v1  ;;  %926 = vmatmul.bf16.vlgmr.msra.gmra.mxu3 %v846_v5  ;;  %v1382_v33 = vpop.eup %1381  ;;  %v771_v53 = vsel %vm1956_vm14, %v1892_v34, %v767_v63  ;;  %v775_v60 = vor.u32 1.1754944e-38, %v774_v38  ;;  %v780_v0 = vsub.f32 1.0, %v779_v40 }
 0x11a   : > { %v587_v23 = vmax.f32 %v585_v16, %v586_v25  ;;  %1389 = vrcp.f32 %v627_v27  ;;  %v1960_v51 = vadd.f32 1.0, %v1382_v33  ;;  %v663_v59 = vadd.f32 %v662_v30, %v661_v22 }
 0x11b   : > { %v1384_v35 = vpop.eup %1383  ;;  %1391 = vpow2.f32 %v1191_v17  ;;  %v776_v45 = vsel %vm773_vm15, %v775_v60, %v771_v53  ;;  %v781_v16 = vmul.f32 %v1920_v15, %v780_v0  ;;  %v530_v18 = vpop.f32.mrf.mxu1  ;;  %v529_v1 = vadd.f32 %v528_v46, %v1805_v4 }
 0x11c   : > { %v1386_v26 = vpop.eup %1385  ;;  %v646_v58 = vmul.f32 %v1384_v35, %v524_v50  ;;  %v588_v39 = vrot.slane %v587_v23, 1  ;;  %1393 = vrcp.f32 %v1960_v51  ;;  %vm784_vm1 = vweird.f32 %v1920_v15 }
 0x11d   : > { %v1948_v41 = vpop.eup %1387  ;;  %v628_v43 = vadd.f32 %v1386_v26, %v1384_v35  ;;  %v647_v44 = vmul.f32 %v1386_v26, %v526_v37  ;;  %v531_v27 = vadd.f32 %v530_v18, %v1805_v4  ;;  %v782_v28 = vadd.f32 %v1920_v15, %v781_v16  ;;  %vm1992_vm4 = vmor %vm783_vm0, %vm784_vm1 }
 0x11e   : > { %v589_v52 = vmax.f32 %v587_v23, %v588_v39  ;;  %v794_v2 = vmul.f32 %v1948_v41, %v1916_v9  ;;  %v787_v29 = vand.u32 2147483647, %v1894_v36  ;;  %v789_v17 = vand.u32 2147483648, %v1894_v36 }
 0x11f   : > { %v629_v54 = vrot.slane %v628_v43, 4  ;;  %v664_v55 = vadd.f32 %v647_v44, %v646_v58  ;;  %vm798_vm2 = vweird.f32 %v1916_v9  ;;  %vm799_vm3 = vweird.f32 %v1948_v41 }
 0x120   : > { %v1390_v61 = vpop.eup %1389  ;;  %v596_v62 = vsub.f32 %v1902_v42, %v589_v52  ;;  %v597_v56 = vsub.f32 %v1910_v57, %v589_v52  ;;  %v795_v57 = vsub.f32 1.0, %v794_v2  ;;  %v804_v30 = vand.u32 2147483648, %v1916_v9  ;;  %vm800_vm6 = vmor %vm798_vm2, %vm799_vm3 }
 0x121   : > { %v1392_v3 = vpop.eup %1391  ;;  %v630_v6 = vadd.f32 %v629_v54, %v628_v43  ;;  %v665_v7 = vrot.slane %v664_v55, 4  ;;  %v683_v8 = vmul.f32 %v1390_v61, %v663_v59  ;;  %vm1998_vm5 = vcmp.eq.f32.partialorder %v787_v29, 8.507059e+37 }
 0x122   : > { %v610_v34 = vmul.f32 1.442695, %v596_v62  ;;  %v612_v10 = vmul.f32 1.442695, %v597_v56  ;;  %v1970_v24 = vadd.f32 1.0, %v1392_v3  ;;  %v1974_v20 = vpop.eup %1393  ;;  %v796_v22 = vmul.f32 %v1948_v41, %v795_v57 }
 0x123   : > { %v631_v11 = vrot.slane %v630_v6, 2  ;;  %v666_v12 = vadd.f32 %v665_v7, %v664_v55  ;;  %v840_v42 = vmul.f32 %v761_v47, %v683_v8  ;;  %v841_v48 = vmul.f32 %v776_v45, %v683_v8 }
 0x124   : > { %1395 = vpow2.f32 %v610_v34  ;;  %v797_v37 = vadd.f32 %v1948_v41, %v796_v22  ;;  %v802_v39 = vand.u32 2147483647, %v1916_v9  ;;  %v786_v36 = vsel %vm1992_vm4, %v1920_v15, %v782_v28 }
 0x125   : > { %v632_v50 = vadd.f32 %v631_v11, %v630_v6  ;;  %1397 = vpow2.f32 %v612_v10  ;;  %v667_v13 = vrot.slane %v666_v12, 2  ;;  %v847_v14 = vpack.c.bf16 %v841_v48, %v840_v42 }
 0x126   : > { %1399 = vrcp.f32 %v1970_v24  ;;  %v790_v40 = vor.u32 1.1754944e-38, %v789_v17  ;;  %v809_v43 = vmul.f32 %v1974_v20, %v1960_v51  ;;  %v801_v52 = vsel %vm800_vm6, %v1948_v41, %v797_v37 }
 0x127   : > { %v633_v19 = vrot.slane %v632_v50, 1  ;;  %v668_v21 = vadd.f32 %v667_v13, %v666_v12  ;;  %v805_v54 = vor.u32 1.1754944e-38, %v804_v30  ;;  %vm803_vm7 = vcmp.eq.f32.partialorder %v802_v39, 8.507059e+37 }
 0x128   : > { %v791_v9 = vsel %vm1998_vm5, %v790_v40, %v786_v36  ;;  %v810_v61 = vsub.f32 1.0, %v809_v43  ;;  %vm813_vm8 = vweird.f32 %v1960_v51  ;;  %vm814_vm9 = vweird.f32 %v1974_v20 }
 0x129   : > { %931 = vmatmul.bf16.gmra.mxu3 %v847_v14  ;;  %v634_v5 = vadd.f32 %v633_v19, %v632_v50  ;;  %v669_v35 = vrot.slane %v668_v21, 1  ;;  %v806_v60 = vsel %vm803_vm7, %v805_v54, %v801_v52  ;;  %v817_v10 = vand.u32 2147483647, %v1960_v51  ;;  %vm815_vm12 = vmor %vm813_vm8, %vm814_vm9 }
 0x12a   : > { %v1396_v25 = vpop.eup %1395  ;;  %v811_v41 = vmul.f32 %v1974_v20, %v810_v61  ;;  %v819_v11 = vand.u32 2147483648, %v1960_v51  ;;  %vm828_vm10 = vweird.f32 %v1970_v24  ;;  %v834_v57 = vand.u32 2147483648, %v1970_v24 }
 0x12b   : > { %v1398_v31 = vpop.eup %1397  ;;  %v648_v32 = vmul.f32 %v1396_v25, %v529_v1  ;;  %1401 = vrcp.f32 %v634_v5  ;;  %v670_v49 = vadd.f32 %v669_v35, %v668_v21  ;;  %v832_v50 = vand.u32 2147483647, %v1970_v24 }
 0x12c   : > { %v1986_v33 = vpop.eup %1399  ;;  %v635_v23 = vadd.f32 %v1398_v31, %v1396_v25  ;;  %v649_v63 = vmul.f32 %v1398_v31, %v531_v27  ;;  %v812_v42 = vadd.f32 %v1974_v20, %v811_v41  ;;  %v820_v13 = vor.u32 1.1754944e-38, %v819_v11 }
 0x12d   : > { %v824_v44 = vmul.f32 %v1986_v33, %v1970_v24  ;;  %vm829_vm11 = vweird.f32 %v1986_v33  ;;  %vm818_vm14 = vcmp.eq.f32.partialorder %v817_v10, 8.507059e+37  ;;  %v835_v19 = vor.u32 1.1754944e-38, %v834_v57  ;;  %v1348_v24 = vld [vmem:[%s2071_s4] ss:$0 sm:$0xff] }
 0x12e   : > { %v636_v38 = vrot.slane %v635_v23, 4  ;;  %v671_v26 = vadd.f32 %v649_v63, %v648_v32  ;;  %vm830_vm13 = vmor %vm828_vm10, %vm829_vm11  ;;  %v816_v16 = vsel %vm815_vm12, %v1974_v20, %v812_v42  ;;  %vm833_vm15 = vcmp.eq.f32.partialorder %v832_v50, 8.507059e+37 }
 0x12f   : > { %v825_v62 = vsub.f32 1.0, %v824_v44  ;;  %v821_v22 = vsel %vm818_vm14, %v820_v13, %v816_v16 }
 0x130   : > { %v637_v46 = vadd.f32 %v636_v38, %v635_v23  ;;  %v672_v47 = vrot.slane %v671_v26, 4 }
 0x131   : > { %v1402_v53 = vpop.eup %1401  ;;  %v826_v45 = vmul.f32 %v1986_v33, %v825_v62 }
 0x132   : > { %v638_v55 = vrot.slane %v637_v46, 2  ;;  %v673_v59 = vadd.f32 %v672_v47, %v671_v26  ;;  %v684_v15 = vmul.f32 %v1402_v53, %v670_v49 }
 0x133   : > { %v827_v48 = vadd.f32 %v1986_v33, %v826_v45 }
 0x134   : > { %v639_v56 = vadd.f32 %v638_v55, %v637_v46  ;;  %v674_v0 = vrot.slane %v673_v59, 2  ;;  %v842_v2 = vmul.f32 %v791_v9, %v684_v15  ;;  %v843_v3 = vmul.f32 %v806_v60, %v684_v15 }
 0x135   : > { %v831_v51 = vsel %vm830_vm13, %v1986_v33, %v827_v48 }
 0x136   : > { %v848_v6 = vpack.c.bf16 %v843_v3, %v842_v2  ;;  %v640_v7 = vrot.slane %v639_v56, 1  ;;  %v675_v8 = vadd.f32 %v674_v0, %v673_v59  ;;  %v836_v1 = vsel %vm833_vm15, %v835_v19, %v831_v51 }
 0x138   : > { %v641_v34 = vadd.f32 %v640_v7, %v639_v56  ;;  %v676_v12 = vrot.slane %v675_v8, 1 }
 0x139   : > { %936 = vmatmul.bf16.gmra.mxu3 %v848_v6 }
 0x13a   : > { %1403 = vrcp.f32 %v641_v34  ;;  %v677_v14 = vadd.f32 %v676_v12, %v675_v8 }
 0x140   : > { %v1404_v18 = vpop.eup %1403 }
 0x141   : > { %v685_v21 = vmul.f32 %v1404_v18, %v677_v14 }
 0x143   : > { %v844_v5 = vmul.f32 %v821_v22, %v685_v21  ;;  %v845_v25 = vmul.f32 %v836_v1, %v685_v21 }
 0x145   : > { %v849_v27 = vpack.c.bf16 %v845_v25, %v844_v5 }
 0x149   : > { %941 = vmatmul.bf16.gmra.mxu3 %v849_v27 }
 0x19c   : > { %v927_v28 = vpop.f32.mrf.mxu3 }
 0x19d   : > { %v928_v20 = vadd.f32 %v1348_v24, %v927_v28 }
 0x19f   : > { %947 = vst [vmem:[%s292_s16] sm:$0xff] %v928_v20 }
 0x1a4   : > { %v929_v29 = vpop.f32.mrf.mxu3 }
 0x1a5   : > { %v930_v17 = vadd.f32 %v1348_v24, %v929_v29 }
 0x1a7   : > { %948 = vst [vmem:[%s292_s16 + $0x8] sm:$0xff] %v930_v17 }
 0x1ac   : > { %v932_v31 = vpop.f32.mrf.mxu3 }
 0x1ad   : > { %v933_v32 = vadd.f32 %v1348_v24, %v932_v31 }
 0x1af   : > { %949 = vst [vmem:[%s292_s16 + $0x10] sm:$0xff] %v933_v32 }
 0x1b4   : > { %v934_v33 = vpop.f32.mrf.mxu3 }
 0x1b5   : > { %v935_v23 = vadd.f32 %v1348_v24, %v934_v33 }
 0x1b7   : > { %950 = vst [vmem:[%s292_s16 + $0x18] sm:$0xff] %v935_v23 }
 0x1bc   : > { %v937_v63 = vpop.f32.mrf.mxu3 }
 0x1bd   : > { %v938_v35 = vadd.f32 %v1348_v24, %v937_v63 }
 0x1bf   : > { %951 = vst [vmem:[%s292_s16 + $0x20] sm:$0xff] %v938_v35 }
 0x1c4   : > { %v939_v4 = vpop.f32.mrf.mxu3 }
 0x1c5   : > { %v940_v37 = vadd.f32 %v1348_v24, %v939_v4 }
 0x1c7   : > { %952 = vst [vmem:[%s292_s16 + $0x28] sm:$0xff] %v940_v37 }
 0x1cc   : > { %v942_v30 = vpop.f32.mrf.mxu3 }
 0x1cd   : > { %v943_v38 = vadd.f32 %v1348_v24, %v942_v30 }
 0x1cf   : > { %953 = vst [vmem:[%s292_s16 + $0x30] sm:$0xff] %v943_v38 }
 0x1d4   : > { %v944_v26 = vpop.f32.mrf.mxu3 }
 0x1d5   : > { %v945_v58 = vadd.f32 %v1348_v24, %v944_v26 }
 0x1d7   : > { %954 = vst [vmem:[%s292_s16 + $0x38] sm:$0xff] %v945_v58 }
 0x1d8   : > { %1552 = shalt.err (!%p1549_p10)
}
 0x1d9   : > { %s1610_s17 = smov 128   ;;  %s1611_s29 = smov 8  }
 0x1da   : > { %1277 = dma.vmem_to_hbm [thread:$0]  (%p1725_p7), %s969_s12, 1024, %s971_s13, %s956_s14, %s1610_s17, %s1610_s17, %s1611_s29  }
 0x1db PF: > { %s985_s16 = sand.u32 1, %s1587_s18   ;;  %p2097_p12 = scmp.ge.s32.totalorder %s1599_s21, 2 }
 0x1dc   : > { %s986_s23 = scalar_lea.sflag [#allocation4], %s985_s16 }
 0x1dd   : > { %p1294_p13 = pnand %p2097_p12, %p1677_p6 }
 0x1df   : > { %p1295_p0 = pneg %p1294_p13 }
 0x1e1   : > { %1582 = dma.done.wait (%p1295_p0), %s986_s23, 1024  }
 0x1e2   : > { %1584 = vsyncadd (%p1295_p0), %s986_s23, 4294966272  ;;  %p20_p3 = scmp.ge.s32.totalorder %s1711_s30, 4   ;;  %s2098_s18 = smov %s1591_s19 }
 0x1e3   : > { %s2099_s19 = smov %s1595_s20  ;;  %s2100_s20 = smov %s1721_s9 }
 0x1e4   : > { %s2101_s21 = smov %s1711_s30  ;;  %22 = sbr.rel (!%p20_p3) target bundleno = 7 (0x7), region = 97 }
 0x1e9   :  { %992 = vsyncpa [#allocation3], 1 }
 0x1ea   :  { %994 = vsyncpa [#allocation3 + $0x1], 1 }
 0x1eb   :  { %995 = vsyncpa [#allocation6], 1 }
 0x1ec   :  { %996 = vsyncpa [#allocation9], 1 }
 0x1ed   :  { %997 = vsyncpa [#allocation4], 1 }
 0x1ee   :  { %999 = vsyncpa [#allocation4 + $0x1], 1 }

// kernel: tpu_custom_call.1
= control target key start
LH: loop header
LB: loop body
LE: loop exit
PB: predicated region body
PF: predicated region fallthrough
CT: control target
= control target key end

     0   :  { %10 = vsyncpa [#allocation3], 0  ;;  %s2067_s0 = inlined_call_operand.hbm [shape: f32[128,128], index: 0, kind: input, shape index: {}]   ;;  %s2068_s1 = inlined_call_operand.hbm [shape: bf16[128,384], index: 1, kind: input, shape index: {}]   ;;  %s2069_s2 = inlined_call_operand.hbm [shape: f32[1,384], index: 2, kind: input, shape index: {}]   ;;  %s2070_s3 = inlined_call_operand.hbm [shape: bf16[128,128], index: 3, kind: input, shape index: {}]   ;;  %s2071_s4 = inlined_call_operand.vmem [shape: f32[1,128], index: 4, kind: input, shape index: {}]   ;;  %s2072_s5 = inlined_call_operand.hbm [shape: f32[128,128], index: 5, kind: output, shape index: {}]  }
   0x1   :  { %12 = vsyncpa [#allocation3 + $0x1], 0 }
   0x2   :  { %13 = vsyncpa [#allocation6], 0 }
   0x3   :  { %14 = vsyncpa [#allocation9], 0 }
   0x4   :  { %15 = vsyncpa [#allocation4], 0 }
   0x5   :  { %17 = vsyncpa [#allocation4 + $0x1], 0  ;;  %s1642_s18 = smov 0   ;;  %s1644_s19 = smov 0  }
   0x6   :  { %s1646_s20 = smov 0   ;;  %s1648_s21 = smov 0  }
   0x7 LB: > { %s1663_s22 = sadd.s32 4294967295, %s1599_s21   ;;  %s1073_s23 = sadd.s32 4294967294, %s1599_s21   ;;  %s1599_s21 = sphi %s1648_s21, %s2101_s21   ;;  %s1595_s20 = sphi %s1646_s20, %s2100_s20   ;;  %s1591_s19 = sphi %s1644_s19, %s2099_s19   ;;  %s1587_s18 = sphi %s1642_s18, %s2098_s18  }
   0x8   : > { %p43_p0 = scmp.ne.s32.totalorder %s1591_s19, %s1587_s18  ;;  %p44_p1 = scmp.eq.s32.totalorder %s1663_s22, 0 }
   0x9   : > { %p151_p2 = scmp.eq.s32.totalorder %s1663_s22, 1  ;;  %p157_p3 = scmp.eq.s32.totalorder %s1073_s23, 1 }
   0xa   : > { %p1672_p4 = por %p44_p1, %p43_p0  ;;  %p1074_p5 = scmp.ge.s32.totalorder %s1599_s21, 1 }
   0xb   : > { %p1677_p6 = por %p157_p3, %p43_p0  ;;  %p164_p7 = scmp.lt.s32.totalorder %s1599_s21, 3 }
   0xc   : > { %s175_s28 = sshll.u32 %s2068_s1, 4  ;;  %s1601_s30 = smov [#allocation5]   ;;  %s176_s28 = int_to_ptr.hbm [resolvable:$true] %s175_s28 }
   0xd   : > { %p1685_p8 = pnand %p1074_p5, %p164_p7  ;;  %s177_s6 = sshll.u32 %s1601_s30, 4  ;;  %s178_s6 = int_to_ptr.vmem [resolvable:$true] %s177_s6 }
   0xe   : > { %s190_s10 = sshll.u32 %s2069_s2, 4  ;;  %s1602_s11 = smov 192   ;;  %s191_s10 = int_to_ptr.hbm [resolvable:$true] %s190_s10 }
   0xf   : > { %p1279_p9 = pneg %p1685_p8  ;;  %s1603_s12 = smov 12  }
  0x10   : > { %s1604_s13 = smov [#allocation7]   ;;  %s201_s17 = sshll.u32 %s2070_s3, 4  ;;  %s202_s17 = int_to_ptr.hbm [resolvable:$true] %s201_s17 }
  0x11   : > { %p1693_p10 = pnand %p1279_p9, %p44_p1  ;;  %s192_s14 = sshll.u32 %s1604_s13, 4  ;;  %s193_s14 = int_to_ptr.vmem [resolvable:$true] %s192_s14 }
  0x12   : > { %s1605_s23 = smov [#allocation8]   ;;  %s1606_s27 = smov 64  }
  0x13   : > { %1282 = dma.hbm_to_vmem [thread:$0]  (!%p1693_p10), %s176_s28, 3072, %s178_s6, [#allocation6], %s1602_s11, %s1602_s11, %s1603_s12  }
  0x14   : > { %1285 = dma.hbm_to_vmem [thread:$0]  (!%p1693_p10), %s191_s10, 48, %s193_s14, [#allocation6]  }
  0x15   : > { %s203_s26 = sshll.u32 %s1605_s23, 4  ;;  %s1607_s28 = smov 4   ;;  %s204_s26 = int_to_ptr.vmem [resolvable:$true] %s203_s26 }
  0x16   : > { %1288 = dma.hbm_to_vmem [thread:$0]  (!%p1693_p10), %s202_s17, 1024, %s204_s26, [#allocation9], %s1606_s27, %s1606_s27, %s1607_s28  }
  0x17   : > { %s1711_s30 = sadd.s32 1, %s1599_s21   ;;  %s30_s8 = sadd.s32 1, %s1595_s20 }
  0x18   : > { %s27_s6 = ssub.s32 %s1599_s21, %s1711_s30  ;;  %p37_p13 = scmp.ne.s32.totalorder %s1595_s20, %s1591_s19 }
  0x19   : > { %p28_p12 = scmp.eq.s32.totalorder %s27_s6, 0  ;;  %p38_p0 = scmp.eq.s32.totalorder %s1599_s21, 0 }
  0x1a   : > { %p1300_p3 = scmp.lt.s32.totalorder %s1599_s21, 2  ;;  %p1725_p7 = por %p151_p2, %p37_p13 }
  0x1b   : > { %s1721_s9 = scalar_select %p28_p12, %s1595_s20, %s30_s8  }
  0x1c   : > { %p39_p5 = por %p38_p0, %p37_p13  ;;  %s220_s7 = sand.u32 1, %s1595_s20  }
  0x1d   : > { %s1229_s11 = sshll.u32 %s1599_s21, 6  ;;  %s1079_s12 = sshll.u32 %s220_s7, 6 }
  0x1e   : > { %s229_s15 = scalar_lea.hbm %s2067_s0, %s1229_s11  ;;  %s224_s17 = scalar_lea.vmem [#allocation2], %s1079_s12 }
  0x1f   : > { %s230_s16 = sshll.u32 %s229_s15, 4  ;;  %s232_s23 = sshll.u32 %s224_s17, 4  ;;  %s231_s16 = int_to_ptr.hbm [resolvable:$true] %s230_s16  ;;  %s233_s23 = int_to_ptr.vmem [resolvable:$true] %s232_s23 }
  0x20   : > { %p1736_p9 = pnand %p1300_p3, %p39_p5  ;;  %s221_s27 = scalar_lea.sflag [#allocation3], %s220_s7 }
  0x21   : > { %s1495_s28 = sshra.s32 %s231_s16, 4  ;;  %s1502_s12 = scalar_lea.hbm %s2067_s0, 128  ;;  %s1496_s28 = int_to_ptr.hbm [resolvable:$true] %s1495_s28 }
  0x22   : > { %s1497_s6 = scalar_lea.hbm %s1496_s28, 64  ;;  %p1499_p10 = pneg %p1736_p9 }
  0x23   : > { %p1498_p2 = scmp.ne.s32.totalorder %s1496_s28, %s1497_s6  ;;  %p1503_p0 = scmp.lt.s32.totalorder %s1496_s28, %s2067_s0 }
  0x24   : > { %p1504_p3 = scmp.lt.s32.totalorder %s1502_s12, %s1497_s6 }
  0x25   : > { %p1500_p12 = pnand %p1499_p10, %p1498_p2 }
  0x26   : > { %p1505_p5 = por %p1504_p3, %p1503_p0 }
  0x27   : > { %p1501_p13 = pneg %p1500_p12 }
  0x29   : > { %p1506_p11 = pnand %p1505_p5, %p1501_p13 }
  0x2b   : > { %1509 = shalt.err (!%p1506_p11)
}
  0x2c   : > { %s1608_s7 = smov 128   ;;  %s1609_s15 = smov 8  }
  0x2d   : > { %1292 = dma.hbm_to_vmem [thread:$0]  (!%p1736_p9), %s231_s16, 1024, %s233_s23, %s221_s27, %s1608_s7, %s1608_s7, %s1609_s15  }
  0x2e   : > { %244 = sbr.rel (%p1685_p8) target bundleno = 475 (0x1db), region = 40  ;;  %s1753_s17 = sand.u32 (!%p1685_p8), 1, %s1591_s19  }
  0x2f   : > { %s1083_s28 = sshll.u32 (!%p1685_p8), %s1753_s17, 6  ;;  %s247_s6 = scalar_lea.sflag (!%p1685_p8), [#allocation3], %s1753_s17 }
  0x30   : > { %s1759_s8 = scalar_lea.vmem (!%p1685_p8), [#allocation2], %s1083_s28 }
  0x33   : > { %1570 = dma.done.wait (%p1672_p4), %s247_s6, 1024  }
  0x34   : > { %1572 = vsyncadd (%p1672_p4), %s247_s6, 4294966272 }
  0x35   : > { %1574 = dma.done.wait (%p44_p1), [#allocation6], 3120  }
  0x36   : > { %1576 = vsyncadd (%p44_p1), [#allocation6], 4294964176 }
  0x37   : > { %1578 = dma.done.wait (%p44_p1), [#allocation9], 1024  }
  0x38   : > { %1580 = vsyncadd (%p44_p1), [#allocation9], 4294966272  ;;  %v1174_v0 = vld [vmem:[#allocation5 + $0xa8] sm:$0xf]  ;;  %v1252_v1 = vld [vmem:[#allocation5 + $0xb0] sm:$0xf0] }
  0x39   : > { %v1182_v2 = vld [vmem:[#allocation5 + $0xb0] sm:$0xf]  ;;  %v1175_v3 = vor.u32 %v1252_v1, %v1174_v0  ;;  %v1253_v4 = vld [vmem:[#allocation5 + $0xb8] sm:$0xf0]  ;;  %v1170_v8 = vld [vmem:[#allocation5 + $0x98] sm:$0xf] }
  0x3a   : > { %v1162_v5 = vld [vmem:[#allocation5 + $0x90] sm:$0xf]  ;;  %v1249_v6 = vld [vmem:[#allocation5 + $0x98] sm:$0xf0]  ;;  %v1183_v7 = vor.u32 %v1253_v4, %v1182_v2  ;;  %v1250_v9 = vld [vmem:[#allocation5 + $0xa0] sm:$0xf0] }
  0x3b   : > { %475 = vmatpush.bf16.msra.mxu0 %v1175_v3  ;;  %v1163_v10 = vor.u32 %v1249_v6, %v1162_v5  ;;  %v1171_v11 = vor.u32 %v1250_v9, %v1170_v8  ;;  %v1150_v12 = vld [vmem:[#allocation5 + $0x78] sm:$0xf]  ;;  %v1246_v13 = vld [vmem:[#allocation5 + $0x80] sm:$0xf0]  ;;  %v1158_v14 = vld [vmem:[#allocation5 + $0x80] sm:$0xf] }
  0x3c   : > { %533 = vmatpush.bf16.msra.mxu2 %v1183_v7  ;;  %v1247_v15 = vld [vmem:[#allocation5 + $0x88] sm:$0xf0]  ;;  %v1151_v16 = vor.u32 %v1246_v13, %v1150_v12  ;;  %v1138_v17 = vld [vmem:[#allocation5 + $0x60] sm:$0xf]  ;;  %v1176_v21 = vld [vmem:[#allocation5 + $0xb4] sm:$0xf0] }
  0x3d   : > { %v1159_v18 = vor.u32 %v1247_v15, %v1158_v14  ;;  %v1243_v19 = vld [vmem:[#allocation5 + $0x68] sm:$0xf0]  ;;  %v1146_v22 = vld [vmem:[#allocation5 + $0x68] sm:$0xf]  ;;  %v1244_v23 = vld [vmem:[#allocation5 + $0x70] sm:$0xf0] }
  0x3e   : > { %v1251_v20 = vld [vmem:[#allocation5 + $0xac] sm:$0xf]  ;;  %v1248_v25 = vld [vmem:[#allocation5 + $0x94] sm:$0xf]  ;;  %v1164_v26 = vld [vmem:[#allocation5 + $0x9c] sm:$0xf0]  ;;  %v1139_v27 = vor.u32 %v1243_v19, %v1138_v17  ;;  %v1147_v30 = vor.u32 %v1244_v23, %v1146_v22 }
  0x3f   : > { %476 = vmatpush.bf16.msra.mxu0 %v1163_v10  ;;  %v1179_v24 = vor.u32 %v1251_v20, %v1176_v21  ;;  %v1126_v28 = vld [vmem:[#allocation5 + $0x48] sm:$0xf]  ;;  %v1167_v29 = vor.u32 %v1248_v25, %v1164_v26  ;;  %v1240_v31 = vld [vmem:[#allocation5 + $0x50] sm:$0xf0]  ;;  %v1245_v32 = vld [vmem:[#allocation5 + $0x7c] sm:$0xf] }
  0x40   : > { %534 = vmatpush.bf16.msra.mxu2 %v1171_v11  ;;  %v1152_v33 = vld [vmem:[#allocation5 + $0x84] sm:$0xf0]  ;;  %v1134_v34 = vld [vmem:[#allocation5 + $0x50] sm:$0xf]  ;;  %v1241_v35 = vld [vmem:[#allocation5 + $0x58] sm:$0xf0]  ;;  %v1127_v36 = vor.u32 %v1240_v31, %v1126_v28 }
  0x41   : > { %504 = vmatpush.bf16.msra.mxu1 %v1179_v24  ;;  %v1114_v37 = vld [vmem:[#allocation5 + $0x30] sm:$0xf]  ;;  %v1237_v38 = vld [vmem:[#allocation5 + $0x38] sm:$0xf0]  ;;  %v1155_v39 = vor.u32 %v1245_v32, %v1152_v33  ;;  %v1135_v40 = vor.u32 %v1241_v35, %v1134_v34  ;;  %v1242_v41 = vld [vmem:[#allocation5 + $0x64] sm:$0xf] }
  0x42   : > { %v1140_v42 = vld [vmem:[#allocation5 + $0x6c] sm:$0xf0]  ;;  %v1122_v43 = vld [vmem:[#allocation5 + $0x38] sm:$0xf]  ;;  %v1238_v44 = vld [vmem:[#allocation5 + $0x40] sm:$0xf0]  ;;  %v1115_v45 = vor.u32 %v1237_v38, %v1114_v37 }
  0x43   : > { %477 = vmatpush.bf16.msra.mxu0 %v1151_v16  ;;  %v1102_v46 = vld [vmem:[#allocation5 + $0x18] sm:$0xf]  ;;  %v1143_v47 = vor.u32 %v1242_v41, %v1140_v42  ;;  %v1123_v48 = vor.u32 %v1238_v44, %v1122_v43  ;;  %v1234_v49 = vld [vmem:[#allocation5 + $0x20] sm:$0xf0]  ;;  %v1239_v50 = vld [vmem:[#allocation5 + $0x4c] sm:$0xf] }
  0x44   : > { %535 = vmatpush.bf16.msra.mxu2 %v1159_v18  ;;  %v1128_v51 = vld [vmem:[#allocation5 + $0x54] sm:$0xf0]  ;;  %v1110_v52 = vld [vmem:[#allocation5 + $0x20] sm:$0xf]  ;;  %v1235_v53 = vld [vmem:[#allocation5 + $0x28] sm:$0xf0]  ;;  %v1103_v54 = vor.u32 %v1234_v49, %v1102_v46 }
  0x45   : > { %505 = vmatpush.bf16.msra.mxu1 %v1167_v29  ;;  %v1090_v55 = vld [vmem:[#allocation5] sm:$0xf]  ;;  %v1131_v56 = vor.u32 %v1239_v50, %v1128_v51  ;;  %v1111_v57 = vor.u32 %v1235_v53, %v1110_v52  ;;  %v1231_v58 = vld [vmem:[#allocation5 + $0x8] sm:$0xf0]  ;;  %v1236_v59 = vld [vmem:[#allocation5 + $0x34] sm:$0xf] }
  0x46   : > { %v1116_v60 = vld [vmem:[#allocation5 + $0x3c] sm:$0xf0]  ;;  %v1098_v61 = vld [vmem:[#allocation5 + $0x8] sm:$0xf]  ;;  %v1232_v62 = vld [vmem:[#allocation5 + $0x10] sm:$0xf0]  ;;  %v1091_v63 = vor.u32 %v1231_v58, %v1090_v55 }
  0x47   : > { %478 = vmatpush.bf16.msra.mxu0 %v1139_v27  ;;  %v295_v0 = vld [vmem:[%s1759_s8] sm:$0xff]  ;;  %v296_v1 = vld [vmem:[%s1759_s8 + $0x8] sm:$0xff]  ;;  %v1119_v2 = vor.u32 %v1236_v59, %v1116_v60  ;;  %v1099_v3 = vor.u32 %v1232_v62, %v1098_v61  ;;  %v1233_v4 = vld [vmem:[#allocation5 + $0x1c] sm:$0xf]  ;;  %s292_s16 = scalar_lea.vmem [#allocation10], %s1083_s28  ;;  %s1262_s23 = sshll.u32 %s1663_s22, 6 }
  0x48   : > { %536 = vmatpush.bf16.msra.mxu2 %v1147_v30  ;;  %v1104_v5 = vld [vmem:[#allocation5 + $0x24] sm:$0xf0]  ;;  %v303_v6 = vpack.c.bf16 %v296_v1, %v295_v0  ;;  %v1230_v8 = vld [vmem:[#allocation5 + $0x4] sm:$0xf]  ;;  %v1092_v9 = vld [vmem:[#allocation5 + $0xc] sm:$0xf0]  ;;  %s967_s11 = scalar_lea.hbm %s2072_s5, %s1262_s23 }
  0x49   : > { %506 = vmatpush.bf16.msra.mxu1 %v1155_v39  ;;  %v1107_v7 = vor.u32 %v1233_v4, %v1104_v5  ;;  %v1095_v10 = vor.u32 %v1230_v8, %v1092_v9  ;;  %v297_v11 = vld [vmem:[%s1759_s8 + $0x10] sm:$0xff]  ;;  %v298_v12 = vld [vmem:[%s1759_s8 + $0x18] sm:$0xff]  ;;  %v299_v14 = vld [vmem:[%s1759_s8 + $0x20] sm:$0xff]  ;;  %s968_s12 = sshll.u32 %s292_s16, 4  ;;  %s970_s13 = sshll.u32 %s967_s11, 4  ;;  %s969_s12 = int_to_ptr.vmem [resolvable:$true] %s968_s12  ;;  %s971_s13 = int_to_ptr.hbm [resolvable:$true] %s970_s13 }
  0x4a   : > { %v304_v13 = vpack.c.bf16 %v298_v12, %v297_v11  ;;  %v300_v15 = vld [vmem:[%s1759_s8 + $0x28] sm:$0xff]  ;;  %v301_v17 = vld [vmem:[%s1759_s8 + $0x30] sm:$0xff]  ;;  %v302_v18 = vld [vmem:[%s1759_s8 + $0x38] sm:$0xff]  ;;  %s956_s14 = scalar_lea.sflag [#allocation4], %s1753_s17  ;;  %s1539_s7 = sshra.s32 %s971_s13, 4  ;;  %s1540_s7 = int_to_ptr.hbm [resolvable:$true] %s1539_s7 }
  0x4b   : > { %479 = vmatpush.bf16.msra.mxu0 %v1127_v36  ;;  %v305_v16 = vpack.c.bf16 %v300_v15, %v299_v14  ;;  %v306_v19 = vpack.c.bf16 %v302_v18, %v301_v17  ;;  %v1261_v21 = vld [vmem:[#allocation8 + $0x38] sm:$0xff]  ;;  %v1260_v25 = vld [vmem:[#allocation8 + $0x30] sm:$0xff]  ;;  %v1259_v31 = vld [vmem:[#allocation8 + $0x28] sm:$0xff]  ;;  %s1541_s15 = scalar_lea.hbm %s1540_s7, 64  ;;  %s1545_s6 = scalar_lea.hbm %s2072_s5, 128 }
  0x4c   : > { %537 = vmatpush.bf16.msra.mxu2 %v1135_v40  ;;  %v339_v22 = vld [vmem:[#allocation7] sm:$0x7]  ;;  %918 = vmatpush.bf16.msra.mxu3 %v1261_v21  ;;  %v1258_v36 = vld [vmem:[#allocation8 + $0x20] sm:$0xff]  ;;  %v1256_v49 = vld [vmem:[#allocation8 + $0x10] sm:$0xff]  ;;  %p1542_p1 = scmp.ne.s32.totalorder %s1540_s7, %s1541_s15  ;;  %p1546_p11 = scmp.lt.s32.totalorder %s1540_s7, %s2072_s5 }
  0x4d   : > { %507 = vmatpush.bf16.msra.mxu1 %v1143_v47  ;;  %v1781_v23 = vperm.slane %v339_v22, 2  ;;  %v1783_v24 = vperm.slane %v339_v22, 0  ;;  %v1257_v42 = vld [vmem:[#allocation8 + $0x18] sm:$0xff]  ;;  %v1255_v58 = vld [vmem:[#allocation8 + $0x8] sm:$0xff]  ;;  %v1805_v4 = vperm.slane %v339_v22, 1  ;;  %p1547_p9 = scmp.lt.s32.totalorder %s1545_s6, %s1541_s15 }
  0x4e   : > { %p1543_p4 = pnand %p1542_p1, %p1725_p7 }
  0x4f   : > { %480 = vmatpush.bf16.msra.mxu0 %v1115_v45  ;;  %p1548_p2 = por %p1547_p9, %p1546_p11 }
  0x50   : > { %538 = vmatpush.bf16.msra.mxu2 %v1123_v48  ;;  %919 = vmatpush.bf16.msra.mxu3 %v1260_v25  ;;  %p1544_p8 = pneg %p1543_p4 }
  0x51   : > { %508 = vmatpush.bf16.msra.mxu1 %v1131_v56 }
  0x52   : > { %p1549_p10 = pnand %p1548_p2, %p1544_p8 }
  0x53   : > { %481 = vmatpush.bf16.msra.mxu0 %v1103_v54 }
  0x54   : > { %539 = vmatpush.bf16.msra.mxu2 %v1111_v57  ;;  %920 = vmatpush.bf16.msra.mxu3 %v1259_v31 }
  0x55   : > { %509 = vmatpush.bf16.msra.mxu1 %v1119_v2 }
  0x57   : > { %482 = vmatpush.bf16.msra.mxu0 %v1091_v63 }
  0x58   : > { %540 = vmatpush.bf16.msra.mxu2 %v1099_v3  ;;  %921 = vmatpush.bf16.msra.mxu3 %v1258_v36  ;;  %v1254_v3 = vld [vmem:[#allocation8] sm:$0xff] }
  0x59   : > { %510 = vmatpush.bf16.msra.mxu1 %v1107_v7 }
  0x5a   : > { %483 = vmatmul.bf16.vlgmr.msra.gmra.mxu0 %v303_v6 }
  0x5b   : > { %541 = vmatmul.bf16.vlgmr.msra.gmra.mxu2 %v303_v6 }
  0x5c   : > { %922 = vmatpush.bf16.msra.mxu3 %v1257_v42 }
  0x5d   : > { %511 = vmatpush.bf16.msra.mxu1 %v1095_v10 }
  0x60   : > { %512 = vmatmul.bf16.vlgmr.msra.gmra.mxu1 %v303_v6  ;;  %923 = vmatpush.bf16.msra.mxu3 %v1256_v49 }
  0x64   : > { %924 = vmatpush.bf16.msra.mxu3 %v1255_v58 }
  0x68   : > { %925 = vmatpush.bf16.msra.mxu3 %v1254_v3 }
  0x6a   : > { %488 = vmatmul.bf16.gmra.mxu0 %v304_v13 }
  0x6b   : > { %546 = vmatmul.bf16.gmra.mxu2 %v304_v13 }
  0x70   : > { %517 = vmatmul.bf16.gmra.mxu1 %v304_v13 }
  0x7a   : > { %493 = vmatmul.bf16.gmra.mxu0 %v305_v16 }
  0x7b   : > { %551 = vmatmul.bf16.gmra.mxu2 %v305_v16 }
  0x80   : > { %522 = vmatmul.bf16.gmra.mxu1 %v305_v16 }
  0x8a   : > { %498 = vmatmul.bf16.gmra.mxu0 %v306_v19 }
  0x8b   : > { %556 = vmatmul.bf16.gmra.mxu2 %v306_v19 }
  0x90   : > { %527 = vmatmul.bf16.gmra.mxu1 %v306_v19 }
  0xd7   : > { %v484_v20 = vpop.f32.mrf.mxu0 }
  0xd8   : > { %v485_v29 = vadd.f32 %v484_v20, %v1783_v24 }
  0xdd   : > { %v513_v33 = vpop.f32.mrf.mxu1 }
  0xde   : > { %v542_v26 = vpop.f32.mrf.mxu2  ;;  %v514_v13 = vadd.f32 %v513_v33, %v1805_v4 }
  0xdf   : > { %v543_v27 = vadd.f32 %v542_v26, %v1781_v23  ;;  %v486_v28 = vpop.f32.mrf.mxu0 }
  0xe0   : > { %v487_v30 = vadd.f32 %v486_v28, %v1783_v24 }
  0xe1   : > { %v1184_v32 = vmul.f32 -1.442695, %v543_v27 }
  0xe2   : > { %v562_v34 = vmax.f32 %v485_v29, %v487_v30 }
  0xe3   : > { %1349 = vpow2.f32 %v1184_v32 }
  0xe4   : > { %v563_v35 = vrot.slane %v562_v34, 4 }
  0xe5   : > { %v515_v47 = vpop.f32.mrf.mxu1 }
  0xe6   : > { %v564_v37 = vmax.f32 %v562_v34, %v563_v35  ;;  %v544_v38 = vpop.f32.mrf.mxu2  ;;  %v516_v19 = vadd.f32 %v515_v47, %v1805_v4 }
  0xe7   : > { %v545_v39 = vadd.f32 %v544_v38, %v1781_v23  ;;  %v489_v40 = vpop.f32.mrf.mxu0 }
  0xe8   : > { %v565_v41 = vrot.slane %v564_v37, 2  ;;  %v1794_v56 = vadd.f32 %v489_v40, %v1783_v24 }
  0xe9   : > { %v1350_v43 = vpop.eup %1349  ;;  %v1185_v44 = vmul.f32 -1.442695, %v545_v39 }
  0xea   : > { %v1789_v45 = vadd.f32 1.0, %v1350_v43  ;;  %v566_v46 = vmax.f32 %v564_v37, %v565_v41 }
  0xeb   : > { %1351 = vpow2.f32 %v1185_v44 }
  0xec   : > { %v567_v48 = vrot.slane %v566_v46, 1  ;;  %1353 = vrcp.f32 %v1789_v45  ;;  %v729_v15 = vand.u32 2147483648, %v1789_v45  ;;  %v727_v25 = vand.u32 2147483647, %v1789_v45 }
  0xed   : > { %v1807_v5 = vpop.f32.mrf.mxu1  ;;  %vm723_vm0 = vweird.f32 %v1789_v45 }
  0xee   : > { %v568_v50 = vmax.f32 %v566_v46, %v567_v48  ;;  %v547_v51 = vpop.f32.mrf.mxu2  ;;  %vm1830_vm2 = vcmp.eq.f32.partialorder %v727_v25, 8.507059e+37 }
  0xef   : > { %v548_v52 = vadd.f32 %v547_v51, %v1781_v23  ;;  %v491_v53 = vpop.f32.mrf.mxu0 }
  0xf0   : > { %v590_v54 = vsub.f32 %v485_v29, %v568_v50  ;;  %v591_v55 = vsub.f32 %v487_v30, %v568_v50  ;;  %v1797_v57 = vadd.f32 %v491_v53, %v1783_v24  ;;  %v1823_v30 = vor.u32 1.1754944e-38, %v729_v15 }
  0xf1   : > { %v1352_v59 = vpop.eup %1351  ;;  %v1186_v60 = vmul.f32 -1.442695, %v548_v52 }
  0xf2   : > { %v598_v61 = vmul.f32 1.442695, %v590_v54  ;;  %v600_v62 = vmul.f32 1.442695, %v591_v55  ;;  %v1799_v63 = vadd.f32 1.0, %v1352_v59  ;;  %v569_v0 = vmax.f32 %v1794_v56, %v1797_v57  ;;  %v1803_v1 = vpop.eup %1353 }
  0xf3   : > { %1355 = vpow2.f32 %v1186_v60  ;;  %v719_v10 = vmul.f32 %v1803_v1, %v1789_v45  ;;  %vm724_vm1 = vweird.f32 %v1803_v1 }
  0xf4   : > { %1357 = vpow2.f32 %v598_v61  ;;  %v570_v2 = vrot.slane %v569_v0, 4  ;;  %vm738_vm3 = vweird.f32 %v1799_v63  ;;  %vm1855_vm4 = vmor %vm723_vm0, %vm724_vm1  ;;  %v744_v3 = vand.u32 2147483648, %v1799_v63 }
  0xf5   : > { %1359 = vpow2.f32 %v600_v62  ;;  %v720_v22 = vsub.f32 1.0, %v719_v10  ;;  %v520_v38 = vpop.f32.mrf.mxu1 }
  0xf6   : > { %1361 = vrcp.f32 %v1799_v63  ;;  %v571_v6 = vmax.f32 %v569_v0, %v570_v2  ;;  %v549_v7 = vpop.f32.mrf.mxu2  ;;  %v742_v0 = vand.u32 2147483647, %v1799_v63 }
  0xf7   : > { %v550_v8 = vadd.f32 %v549_v7, %v1781_v23  ;;  %v494_v9 = vpop.f32.mrf.mxu0  ;;  %v721_v39 = vmul.f32 %v1803_v1, %v720_v22 }
  0xf8   : > { %v572_v11 = vrot.slane %v571_v6, 2  ;;  %v1838_v48 = vadd.f32 %v494_v9, %v1783_v24  ;;  %vm1872_vm6 = vcmp.eq.f32.partialorder %v742_v0, 8.507059e+37 }
  0xf9   : > { %v1356_v12 = vpop.eup %1355  ;;  %v1187_v14 = vmul.f32 -1.442695, %v550_v8  ;;  %v722_v59 = vadd.f32 %v1803_v1, %v721_v39 }
  0xfa   : > { %v1358_v16 = vpop.eup %1357  ;;  %v1815_v17 = vadd.f32 1.0, %v1356_v12  ;;  %v573_v18 = vmax.f32 %v571_v6, %v572_v11 }
  0xfb   : > { %v1360_v20 = vpop.eup %1359  ;;  %v642_v21 = vmul.f32 %v1358_v16, %v514_v13  ;;  %1363 = vpow2.f32 %v1187_v14  ;;  %v726_v13 = vsel %vm1855_vm4, %v1803_v1, %v722_v59  ;;  %v519_v14 = vadd.f32 %v1807_v5, %v1805_v4 }
  0xfc   : > { %v1819_v26 = vpop.eup %1361  ;;  %v614_v27 = vadd.f32 %v1360_v20, %v1358_v16  ;;  %v574_v28 = vrot.slane %v573_v18, 1  ;;  %v643_v29 = vmul.f32 %v1360_v20, %v516_v19  ;;  %1365 = vrcp.f32 %v1815_v17 }
  0xfd   : > { %v734_v31 = vmul.f32 %v1819_v26, %v1799_v63  ;;  %vm739_vm5 = vweird.f32 %v1819_v26  ;;  %v521_v20 = vadd.f32 %v520_v38, %v1805_v4  ;;  %v523_v22 = vpop.f32.mrf.mxu1  ;;  %v745_v5 = vor.u32 1.1754944e-38, %v744_v3 }
  0xfe   : > { %v615_v32 = vrot.slane %v614_v27, 4  ;;  %v575_v33 = vmax.f32 %v573_v18, %v574_v28  ;;  %v650_v34 = vadd.f32 %v643_v29, %v642_v21  ;;  %v552_v35 = vpop.f32.mrf.mxu2  ;;  %vm1881_vm7 = vmor %vm738_vm3, %vm739_vm5  ;;  %vm753_vm8 = vweird.f32 %v1815_v17 }
  0xff   : > { %v553_v36 = vadd.f32 %v552_v35, %v1781_v23  ;;  %v496_v37 = vpop.f32.mrf.mxu0  ;;  %v735_v41 = vsub.f32 1.0, %v734_v31  ;;  %v759_v39 = vand.u32 2147483648, %v1815_v17 }
 0x100   : > { %v616_v42 = vadd.f32 %v615_v32, %v614_v27  ;;  %v592_v43 = vsub.f32 %v1794_v56, %v575_v33  ;;  %v593_v44 = vsub.f32 %v1797_v57, %v575_v33  ;;  %v651_v46 = vrot.slane %v650_v34, 4 }
 0x101   : > { %v1364_v47 = vpop.eup %1363  ;;  %v1188_v49 = vmul.f32 -1.442695, %v553_v36  ;;  %v1841_v50 = vadd.f32 %v496_v37, %v1783_v24  ;;  %v736_v51 = vmul.f32 %v1819_v26, %v735_v41  ;;  %v731_v27 = vsel %vm1830_vm2, %v1823_v30, %v726_v13 }
 0x102   : > { %v617_v52 = vrot.slane %v616_v42, 2  ;;  %v602_v53 = vmul.f32 1.442695, %v592_v43  ;;  %v604_v54 = vmul.f32 1.442695, %v593_v44  ;;  %v652_v55 = vadd.f32 %v651_v46, %v650_v34  ;;  %v1844_v58 = vpop.eup %1365 }
 0x103   : > { %v1846_v56 = vadd.f32 1.0, %v1364_v47  ;;  %1367 = vpow2.f32 %v1188_v49  ;;  %v576_v57 = vmax.f32 %v1838_v48, %v1841_v50  ;;  %v737_v8 = vadd.f32 %v1819_v26, %v736_v51 }
 0x104   : > { %v618_v60 = vadd.f32 %v617_v52, %v616_v42  ;;  %1369 = vpow2.f32 %v602_v53  ;;  %v653_v61 = vrot.slane %v652_v55, 2  ;;  %v749_v45 = vmul.f32 %v1844_v58, %v1815_v17 }
 0x105   : > { %1371 = vpow2.f32 %v604_v54  ;;  %v577_v2 = vrot.slane %v576_v57, 4  ;;  %v741_v28 = vsel %vm1881_vm7, %v1819_v26, %v737_v8  ;;  %v757_v30 = vand.u32 2147483647, %v1815_v17 }
 0x106   : > { %1373 = vrcp.f32 %v1846_v56  ;;  %v554_v6 = vpop.f32.mrf.mxu2  ;;  %v619_v7 = vrot.slane %v618_v60, 1  ;;  %v654_v9 = vadd.f32 %v653_v61, %v652_v55  ;;  %v750_v29 = vsub.f32 1.0, %v749_v45 }
 0x107   : > { %v578_v10 = vmax.f32 %v576_v57, %v577_v2  ;;  %v555_v11 = vadd.f32 %v554_v6, %v1781_v23  ;;  %v499_v12 = vpop.f32.mrf.mxu0  ;;  %v746_v26 = vsel %vm1872_vm6, %v745_v5, %v741_v28  ;;  %vm754_vm9 = vweird.f32 %v1844_v58 }
 0x108   : > { %v620_v15 = vadd.f32 %v619_v7, %v618_v60  ;;  %v655_v63 = vrot.slane %v654_v9, 1  ;;  %v1902_v42 = vadd.f32 %v499_v12, %v1783_v24  ;;  %v751_v52 = vmul.f32 %v1844_v58, %v750_v29  ;;  %vm1926_vm10 = vmor %vm753_vm8, %vm754_vm9 }
 0x109   : > { %v1368_v18 = vpop.eup %1367  ;;  %v579_v19 = vrot.slane %v578_v10, 2  ;;  %v1189_v21 = vmul.f32 -1.442695, %v555_v11  ;;  %vm1933_vm11 = vcmp.eq.f32.partialorder %v757_v30, 8.507059e+37  ;;  %v760_v29 = vor.u32 1.1754944e-38, %v759_v39 }
 0x10a   : > { %v1370_v25 = vpop.eup %1369  ;;  %1375 = vrcp.f32 %v620_v15  ;;  %v1894_v36 = vadd.f32 1.0, %v1368_v18  ;;  %v656_v51 = vadd.f32 %v655_v63, %v654_v9  ;;  %vm768_vm12 = vweird.f32 %v1846_v56 }
 0x10b   : > { %v1372_v31 = vpop.eup %1371  ;;  %v644_v32 = vmul.f32 %v1370_v25, %v519_v14  ;;  %v580_v33 = vmax.f32 %v578_v10, %v579_v19  ;;  %1377 = vpow2.f32 %v1189_v21  ;;  %v525_v10 = vpop.f32.mrf.mxu1  ;;  %v752_v14 = vadd.f32 %v1844_v58, %v751_v52 }
 0x10c   : > { %v1892_v34 = vpop.eup %1373  ;;  %v621_v35 = vadd.f32 %v1372_v31, %v1370_v25  ;;  %v645_v37 = vmul.f32 %v1372_v31, %v521_v20  ;;  %1379 = vrcp.f32 %v1894_v36  ;;  %vm783_vm0 = vweird.f32 %v1894_v36 }
 0x10d   : > { %v581_v38 = vrot.slane %v580_v33, 1  ;;  %v764_v44 = vmul.f32 %v1892_v34, %v1846_v56  ;;  %v756_v31 = vsel %vm1926_vm10, %v1844_v58, %v752_v14  ;;  %vm769_vm13 = vweird.f32 %v1892_v34 }
 0x10e   : > { %v622_v40 = vrot.slane %v621_v35, 4  ;;  %v657_v41 = vadd.f32 %v645_v37, %v644_v32  ;;  %v557_v43 = vpop.f32.mrf.mxu2  ;;  %v772_v32 = vand.u32 2147483647, %v1846_v56  ;;  %v526_v37 = vadd.f32 %v525_v10, %v1805_v4  ;;  %vm1956_vm14 = vmor %vm768_vm12, %vm769_vm13 }
 0x10f   : > { %v582_v46 = vmax.f32 %v580_v33, %v581_v38  ;;  %v558_v47 = vadd.f32 %v557_v43, %v1781_v23  ;;  %v501_v49 = vpop.f32.mrf.mxu0  ;;  %v765_v7 = vsub.f32 1.0, %v764_v44  ;;  %v774_v38 = vand.u32 2147483648, %v1846_v56 }
 0x110   : > { %v1376_v53 = vpop.eup %1375  ;;  %v623_v54 = vadd.f32 %v622_v40, %v621_v35  ;;  %v658_v55 = vrot.slane %v657_v41, 4  ;;  %v1910_v57 = vadd.f32 %v501_v49, %v1783_v24  ;;  %vm773_vm15 = vcmp.eq.f32.partialorder %v772_v32, 8.507059e+37 }
 0x111   : > { %v1378_v59 = vpop.eup %1377  ;;  %v594_v60 = vsub.f32 %v1838_v48, %v582_v46  ;;  %v595_v61 = vsub.f32 %v1841_v50, %v582_v46  ;;  %v1190_v62 = vmul.f32 -1.442695, %v558_v47  ;;  %v682_v0 = vmul.f32 %v1376_v53, %v656_v51 }
 0x112   : > { %v624_v2 = vrot.slane %v623_v54, 2  ;;  %v659_v3 = vadd.f32 %v658_v55, %v657_v41  ;;  %v583_v6 = vmax.f32 %v1902_v42, %v1910_v57  ;;  %v1916_v9 = vadd.f32 1.0, %v1378_v59  ;;  %v1920_v15 = vpop.eup %1379 }
 0x113   : > { %v606_v8 = vmul.f32 1.442695, %v594_v60  ;;  %v608_v45 = vmul.f32 1.442695, %v595_v61  ;;  %v838_v24 = vmul.f32 %v731_v27, %v682_v0  ;;  %1381 = vpow2.f32 %v1190_v62  ;;  %v528_v46 = vpop.f32.mrf.mxu1 }
 0x114   : > { %v625_v11 = vadd.f32 %v624_v2, %v623_v54  ;;  %v660_v12 = vrot.slane %v659_v3, 2  ;;  %v584_v48 = vrot.slane %v583_v6, 4  ;;  %v524_v50 = vadd.f32 %v523_v22, %v1805_v4 }
 0x115   : > { %1383 = vpow2.f32 %v606_v8  ;;  %v839_v13 = vmul.f32 %v746_v26, %v682_v0  ;;  %v766_v21 = vmul.f32 %v1892_v34, %v765_v7  ;;  %v779_v40 = vmul.f32 %v1920_v15, %v1894_v36 }
 0x116   : > { %1385 = vpow2.f32 %v608_v45  ;;  %v585_v16 = vmax.f32 %v583_v6, %v584_v48  ;;  %v559_v18 = vpop.f32.mrf.mxu2  ;;  %v626_v19 = vrot.slane %v625_v11, 1  ;;  %v661_v22 = vadd.f32 %v660_v12, %v659_v3 }
 0x117   : > { %1387 = vrcp.f32 %v1916_v9  ;;  %v560_v1 = vadd.f32 %v559_v18, %v1781_v23  ;;  %v846_v5 = vpack.c.bf16 %v839_v13, %v838_v24  ;;  %v767_v63 = vadd.f32 %v1892_v34, %v766_v21 }
 0x118   : > { %v586_v25 = vrot.slane %v585_v16, 2  ;;  %v627_v27 = vadd.f32 %v626_v19, %v625_v11  ;;  %v662_v30 = vrot.slane %v661_v22, 1  ;;  %v761_v47 = vsel %vm1933_vm11, %v760_v29, %v756_v31 }
 0x119   : > { %v1191_v17 = vmul.f32 -1.442695, %v560_v1  ;;  %926 = vmatmul.bf16.vlgmr.msra.gmra.mxu3 %v846_v5  ;;  %v1382_v33 = vpop.eup %1381  ;;  %v771_v53 = vsel %vm1956_vm14, %v1892_v34, %v767_v63  ;;  %v775_v60 = vor.u32 1.1754944e-38, %v774_v38  ;;  %v780_v0 = vsub.f32 1.0, %v779_v40 }
 0x11a   : > { %v587_v23 = vmax.f32 %v585_v16, %v586_v25  ;;  %1389 = vrcp.f32 %v627_v27  ;;  %v1960_v51 = vadd.f32 1.0, %v1382_v33  ;;  %v663_v59 = vadd.f32 %v662_v30, %v661_v22 }
 0x11b   : > { %v1384_v35 = vpop.eup %1383  ;;  %1391 = vpow2.f32 %v1191_v17  ;;  %v776_v45 = vsel %vm773_vm15, %v775_v60, %v771_v53  ;;  %v781_v16 = vmul.f32 %v1920_v15, %v780_v0  ;;  %v530_v18 = vpop.f32.mrf.mxu1  ;;  %v529_v1 = vadd.f32 %v528_v46, %v1805_v4 }
 0x11c   : > { %v1386_v26 = vpop.eup %1385  ;;  %v646_v58 = vmul.f32 %v1384_v35, %v524_v50  ;;  %v588_v39 = vrot.slane %v587_v23, 1  ;;  %1393 = vrcp.f32 %v1960_v51  ;;  %vm784_vm1 = vweird.f32 %v1920_v15 }
 0x11d   : > { %v1948_v41 = vpop.eup %1387  ;;  %v628_v43 = vadd.f32 %v1386_v26, %v1384_v35  ;;  %v647_v44 = vmul.f32 %v1386_v26, %v526_v37  ;;  %v531_v27 = vadd.f32 %v530_v18, %v1805_v4  ;;  %v782_v28 = vadd.f32 %v1920_v15, %v781_v16  ;;  %vm1992_vm4 = vmor %vm783_vm0, %vm784_vm1 }
 0x11e   : > { %v589_v52 = vmax.f32 %v587_v23, %v588_v39  ;;  %v794_v2 = vmul.f32 %v1948_v41, %v1916_v9  ;;  %v787_v29 = vand.u32 2147483647, %v1894_v36  ;;  %v789_v17 = vand.u32 2147483648, %v1894_v36 }
 0x11f   : > { %v629_v54 = vrot.slane %v628_v43, 4  ;;  %v664_v55 = vadd.f32 %v647_v44, %v646_v58  ;;  %vm798_vm2 = vweird.f32 %v1916_v9  ;;  %vm799_vm3 = vweird.f32 %v1948_v41 }
 0x120   : > { %v1390_v61 = vpop.eup %1389  ;;  %v596_v62 = vsub.f32 %v1902_v42, %v589_v52  ;;  %v597_v56 = vsub.f32 %v1910_v57, %v589_v52  ;;  %v795_v57 = vsub.f32 1.0, %v794_v2  ;;  %v804_v30 = vand.u32 2147483648, %v1916_v9  ;;  %vm800_vm6 = vmor %vm798_vm2, %vm799_vm3 }
 0x121   : > { %v1392_v3 = vpop.eup %1391  ;;  %v630_v6 = vadd.f32 %v629_v54, %v628_v43  ;;  %v665_v7 = vrot.slane %v664_v55, 4  ;;  %v683_v8 = vmul.f32 %v1390_v61, %v663_v59  ;;  %vm1998_vm5 = vcmp.eq.f32.partialorder %v787_v29, 8.507059e+37 }
 0x122   : > { %v610_v34 = vmul.f32 1.442695, %v596_v62  ;;  %v612_v10 = vmul.f32 1.442695, %v597_v56  ;;  %v1970_v24 = vadd.f32 1.0, %v1392_v3  ;;  %v1974_v20 = vpop.eup %1393  ;;  %v796_v22 = vmul.f32 %v1948_v41, %v795_v57 }
 0x123   : > { %v631_v11 = vrot.slane %v630_v6, 2  ;;  %v666_v12 = vadd.f32 %v665_v7, %v664_v55  ;;  %v840_v42 = vmul.f32 %v761_v47, %v683_v8  ;;  %v841_v48 = vmul.f32 %v776_v45, %v683_v8 }
 0x124   : > { %1395 = vpow2.f32 %v610_v34  ;;  %v797_v37 = vadd.f32 %v1948_v41, %v796_v22  ;;  %v802_v39 = vand.u32 2147483647, %v1916_v9  ;;  %v786_v36 = vsel %vm1992_vm4, %v1920_v15, %v782_v28 }
 0x125   : > { %v632_v50 = vadd.f32 %v631_v11, %v630_v6  ;;  %1397 = vpow2.f32 %v612_v10  ;;  %v667_v13 = vrot.slane %v666_v12, 2  ;;  %v847_v14 = vpack.c.bf16 %v841_v48, %v840_v42 }
 0x126   : > { %1399 = vrcp.f32 %v1970_v24  ;;  %v790_v40 = vor.u32 1.1754944e-38, %v789_v17  ;;  %v809_v43 = vmul.f32 %v1974_v20, %v1960_v51  ;;  %v801_v52 = vsel %vm800_vm6, %v1948_v41, %v797_v37 }
 0x127   : > { %v633_v19 = vrot.slane %v632_v50, 1  ;;  %v668_v21 = vadd.f32 %v667_v13, %v666_v12  ;;  %v805_v54 = vor.u32 1.1754944e-38, %v804_v30  ;;  %vm803_vm7 = vcmp.eq.f32.partialorder %v802_v39, 8.507059e+37 }
 0x128   : > { %v791_v9 = vsel %vm1998_vm5, %v790_v40, %v786_v36  ;;  %v810_v61 = vsub.f32 1.0, %v809_v43  ;;  %vm813_vm8 = vweird.f32 %v1960_v51  ;;  %vm814_vm9 = vweird.f32 %v1974_v20 }
 0x129   : > { %931 = vmatmul.bf16.gmra.mxu3 %v847_v14  ;;  %v634_v5 = vadd.f32 %v633_v19, %v632_v50  ;;  %v669_v35 = vrot.slane %v668_v21, 1  ;;  %v806_v60 = vsel %vm803_vm7, %v805_v54, %v801_v52  ;;  %v817_v10 = vand.u32 2147483647, %v1960_v51  ;;  %vm815_vm12 = vmor %vm813_vm8, %vm814_vm9 }
 0x12a   : > { %v1396_v25 = vpop.eup %1395  ;;  %v811_v41 = vmul.f32 %v1974_v20, %v810_v61  ;;  %v819_v11 = vand.u32 2147483648, %v1960_v51  ;;  %vm828_vm10 = vweird.f32 %v1970_v24  ;;  %v834_v57 = vand.u32 2147483648, %v1970_v24 }
 0x12b   : > { %v1398_v31 = vpop.eup %1397  ;;  %v648_v32 = vmul.f32 %v1396_v25, %v529_v1  ;;  %1401 = vrcp.f32 %v634_v5  ;;  %v670_v49 = vadd.f32 %v669_v35, %v668_v21  ;;  %v832_v50 = vand.u32 2147483647, %v1970_v24 }
 0x12c   : > { %v1986_v33 = vpop.eup %1399  ;;  %v635_v23 = vadd.f32 %v1398_v31, %v1396_v25  ;;  %v649_v63 = vmul.f32 %v1398_v31, %v531_v27  ;;  %v812_v42 = vadd.f32 %v1974_v20, %v811_v41  ;;  %v820_v13 = vor.u32 1.1754944e-38, %v819_v11 }
 0x12d   : > { %v824_v44 = vmul.f32 %v1986_v33, %v1970_v24  ;;  %vm829_vm11 = vweird.f32 %v1986_v33  ;;  %vm818_vm14 = vcmp.eq.f32.partialorder %v817_v10, 8.507059e+37  ;;  %v835_v19 = vor.u32 1.1754944e-38, %v834_v57  ;;  %v1348_v24 = vld [vmem:[%s2071_s4] ss:$0 sm:$0xff] }
 0x12e   : > { %v636_v38 = vrot.slane %v635_v23, 4  ;;  %v671_v26 = vadd.f32 %v649_v63, %v648_v32  ;;  %vm830_vm13 = vmor %vm828_vm10, %vm829_vm11  ;;  %v816_v16 = vsel %vm815_vm12, %v1974_v20, %v812_v42  ;;  %vm833_vm15 = vcmp.eq.f32.partialorder %v832_v50, 8.507059e+37 }
 0x12f   : > { %v825_v62 = vsub.f32 1.0, %v824_v44  ;;  %v821_v22 = vsel %vm818_vm14, %v820_v13, %v816_v16 }
 0x130   : > { %v637_v46 = vadd.f32 %v636_v38, %v635_v23  ;;  %v672_v47 = vrot.slane %v671_v26, 4 }
 0x131   : > { %v1402_v53 = vpop.eup %1401  ;;  %v826_v45 = vmul.f32 %v1986_v33, %v825_v62 }
 0x132   : > { %v638_v55 = vrot.slane %v637_v46, 2  ;;  %v673_v59 = vadd.f32 %v672_v47, %v671_v26  ;;  %v684_v15 = vmul.f32 %v1402_v53, %v670_v49 }
 0x133   : > { %v827_v48 = vadd.f32 %v1986_v33, %v826_v45 }
 0x134   : > { %v639_v56 = vadd.f32 %v638_v55, %v637_v46  ;;  %v674_v0 = vrot.slane %v673_v59, 2  ;;  %v842_v2 = vmul.f32 %v791_v9, %v684_v15  ;;  %v843_v3 = vmul.f32 %v806_v60, %v684_v15 }
 0x135   : > { %v831_v51 = vsel %vm830_vm13, %v1986_v33, %v827_v48 }
 0x136   : > { %v848_v6 = vpack.c.bf16 %v843_v3, %v842_v2  ;;  %v640_v7 = vrot.slane %v639_v56, 1  ;;  %v675_v8 = vadd.f32 %v674_v0, %v673_v59  ;;  %v836_v1 = vsel %vm833_vm15, %v835_v19, %v831_v51 }
 0x138   : > { %v641_v34 = vadd.f32 %v640_v7, %v639_v56  ;;  %v676_v12 = vrot.slane %v675_v8, 1 }
 0x139   : > { %936 = vmatmul.bf16.gmra.mxu3 %v848_v6 }
 0x13a   : > { %1403 = vrcp.f32 %v641_v34  ;;  %v677_v14 = vadd.f32 %v676_v12, %v675_v8 }
 0x140   : > { %v1404_v18 = vpop.eup %1403 }
 0x141   : > { %v685_v21 = vmul.f32 %v1404_v18, %v677_v14 }
 0x143   : > { %v844_v5 = vmul.f32 %v821_v22, %v685_v21  ;;  %v845_v25 = vmul.f32 %v836_v1, %v685_v21 }
 0x145   : > { %v849_v27 = vpack.c.bf16 %v845_v25, %v844_v5 }
 0x149   : > { %941 = vmatmul.bf16.gmra.mxu3 %v849_v27 }
 0x19c   : > { %v927_v28 = vpop.f32.mrf.mxu3 }
 0x19d   : > { %v928_v20 = vadd.f32 %v1348_v24, %v927_v28 }
 0x19f   : > { %947 = vst [vmem:[%s292_s16] sm:$0xff] %v928_v20 }
 0x1a4   : > { %v929_v29 = vpop.f32.mrf.mxu3 }
 0x1a5   : > { %v930_v17 = vadd.f32 %v1348_v24, %v929_v29 }
 0x1a7   : > { %948 = vst [vmem:[%s292_s16 + $0x8] sm:$0xff] %v930_v17 }
 0x1ac   : > { %v932_v31 = vpop.f32.mrf.mxu3 }
 0x1ad   : > { %v933_v32 = vadd.f32 %v1348_v24, %v932_v31 }
 0x1af   : > { %949 = vst [vmem:[%s292_s16 + $0x10] sm:$0xff] %v933_v32 }
 0x1b4   : > { %v934_v33 = vpop.f32.mrf.mxu3 }
 0x1b5   : > { %v935_v23 = vadd.f32 %v1348_v24, %v934_v33 }
 0x1b7   : > { %950 = vst [vmem:[%s292_s16 + $0x18] sm:$0xff] %v935_v23 }
 0x1bc   : > { %v937_v63 = vpop.f32.mrf.mxu3 }
 0x1bd   : > { %v938_v35 = vadd.f32 %v1348_v24, %v937_v63 }
 0x1bf   : > { %951 = vst [vmem:[%s292_s16 + $0x20] sm:$0xff] %v938_v35 }
 0x1c4   : > { %v939_v4 = vpop.f32.mrf.mxu3 }
 0x1c5   : > { %v940_v37 = vadd.f32 %v1348_v24, %v939_v4 }
 0x1c7   : > { %952 = vst [vmem:[%s292_s16 + $0x28] sm:$0xff] %v940_v37 }
 0x1cc   : > { %v942_v30 = vpop.f32.mrf.mxu3 }
 0x1cd   : > { %v943_v38 = vadd.f32 %v1348_v24, %v942_v30 }
 0x1cf   : > { %953 = vst [vmem:[%s292_s16 + $0x30] sm:$0xff] %v943_v38 }
 0x1d4   : > { %v944_v26 = vpop.f32.mrf.mxu3 }
 0x1d5   : > { %v945_v58 = vadd.f32 %v1348_v24, %v944_v26 }
 0x1d7   : > { %954 = vst [vmem:[%s292_s16 + $0x38] sm:$0xff] %v945_v58 }
 0x1d8   : > { %1552 = shalt.err (!%p1549_p10)
}
 0x1d9   : > { %s1610_s17 = smov 128   ;;  %s1611_s29 = smov 8  }
 0x1da   : > { %1277 = dma.vmem_to_hbm [thread:$0]  (%p1725_p7), %s969_s12, 1024, %s971_s13, %s956_s14, %s1610_s17, %s1610_s17, %s1611_s29  }
 0x1db PF: > { %s985_s16 = sand.u32 1, %s1587_s18   ;;  %p2097_p12 = scmp.ge.s32.totalorder %s1599_s21, 2 }
 0x1dc   : > { %s986_s23 = scalar_lea.sflag [#allocation4], %s985_s16 }
 0x1dd   : > { %p1294_p13 = pnand %p2097_p12, %p1677_p6 }
 0x1df   : > { %p1295_p0 = pneg %p1294_p13 }
 0x1e1   : > { %1582 = dma.done.wait (%p1295_p0), %s986_s23, 1024  }
 0x1e2   : > { %1584 = vsyncadd (%p1295_p0), %s986_s23, 4294966272  ;;  %p20_p3 = scmp.ge.s32.totalorder %s1711_s30, 4   ;;  %s2098_s18 = smov %s1591_s19 }
 0x1e3   : > { %s2099_s19 = smov %s1595_s20  ;;  %s2100_s20 = smov %s1721_s9 }
 0x1e4   : > { %s2101_s21 = smov %s1711_s30  ;;  %22 = sbr.rel (!%p20_p3) target bundleno = 7 (0x7), region = 97 }
 0x1e9   :  { %992 = vsyncpa [#allocation3], 1 }
 0x1ea   :  { %994 = vsyncpa [#allocation3 + $0x1], 1 }
 0x1eb   :  { %995 = vsyncpa [#allocation6], 1 }
 0x1ec   :  { %996 = vsyncpa [#allocation9], 1 }
 0x1ed   :  { %997 = vsyncpa [#allocation4], 1 }
 0x1ee   :  { %999 = vsyncpa [#allocation4 + $0x1], 1 }

</bundles_post_ra>
